<compile_context>
chip_gen: v5e
topology: v5e:2x2
jax: 0.10.0
libtpu: 0.0.40
codegen_flags: <defaults>
</compile_context>

<pallas_src>
import functools

import jax
import jax.numpy as jnp
from jax import lax
from jax.experimental import pallas as pl
from jax.experimental.pallas import tpu as pltpu

SUBLANE_ALIGN = 16            # bf16 sublane packing: row tiles are multiples of 16
DEFAULT_TM = 1024             # row-tile cap
MIB = 1024 * 1024

# (kernel, stride) for conv1..conv3; conv4 is fused with the dueling head.
CONV_CFG = ((8, 4), (4, 2), (3, 1))


def _cdiv(a, b):
    return -(-a // b)


def _round_up(x, m):
    return _cdiv(x, m) * m


# ------------------------------ Pallas kernels ------------------------------

def _matmul_relu_kernel(a_ref, b_ref, o_ref):
    acc = jnp.dot(a_ref[...], b_ref[...], preferred_element_type=jnp.float32)
    o_ref[...] = jnp.maximum(acc, 0.0).astype(o_ref.dtype)


def _matmul_relu_matmul_bias_kernel(a_ref, w1_ref, w2_ref, b_ref, o_ref):
    # conv4 (flattened 1x1-spatial matmul) + ReLU + fused dueling head.
    h = jnp.maximum(
        jnp.dot(a_ref[...], w1_ref[...], preferred_element_type=jnp.float32), 0.0)
    out = jnp.dot(h, w2_ref[...], preferred_element_type=jnp.float32)  # f32 head
    o_ref[...] = (out + b_ref[...]).astype(o_ref.dtype)


# ------------------------------ tiling helpers -------------------------------

def _choose_tiles(M, tm_cap=DEFAULT_TM):
    """Pick (tm, m_pad): at least 2 grid steps when M allows it (megacore /
    double-buffering), tm sized from cdiv(M, n_tiles) so padding waste is small."""
    max_tiles = max(1, _cdiv(M, SUBLANE_ALIGN))
    n_tiles = min(max_tiles, max(2, _cdiv(M, tm_cap)))
    tm = _round_up(_cdiv(M, n_tiles), SUBLANE_ALIGN)
    m_pad = _round_up(M, tm)
    return tm, m_pad


def _vmem_limit(*buffer_bytes):
    """Right-size the scoped-VMEM request from the tile footprint (v7x has only
    64 MiB per TensorCore); 3x margin covers multi-buffering + relayout scratch."""
    est = 3 * sum(buffer_bytes) + 2 * MIB
    return int(min(64 * MIB, max(16 * MIB, est)))


def _a_spec(tm, K, n_tiles):
    # Deeper pipeline on the streaming A input only when there is enough grid
    # depth to exploit it (never triggers at inference-sized batches).
    if n_tiles >= 3:
        return pl.BlockSpec((tm, K), lambda i: (i, 0), pipeline_mode=pl.Buffered(3))
    return pl.BlockSpec((tm, K), lambda i: (i, 0))


# ------------------------------ pallas wrappers -------------------------------

def pallas_matmul_relu(a, b, *, tm_cap=DEFAULT_TM):
    """ReLU(a @ b); a:(M,K) bf16, b:(K,N) bf16 with N = real (unpadded) cout."""
    M, K = a.shape
    _, N = b.shape
    tm, m_pad = _choose_tiles(M, tm_cap)
    if m_pad != M:
        a = jnp.pad(a, ((0, m_pad - M), (0, 0)))
    n_tiles = m_pad // tm
    vmem = _vmem_limit(tm * K * 2, K * N * 2, tm * N * 2, tm * N * 4)
    out = pl.pallas_call(
        _matmul_relu_kernel,
        out_shape=jax.ShapeDtypeStruct((m_pad, N), jnp.bfloat16),
        grid=(n_tiles,),
        in_specs=[_a_spec(tm, K, n_tiles),
                  pl.BlockSpec((K, N), lambda i: (0, 0))],     # resident weight
        out_specs=pl.BlockSpec((tm, N), lambda i: (i, 0)),
        compiler_params=pltpu.CompilerParams(
            dimension_semantics=("parallel",), vmem_limit_bytes=vmem),
    )(a, b)
    return out[:M] if m_pad != M else out


def pallas_matmul_relu_matmul_bias(a, w1, w2, bias, *, tm_cap=DEFAULT_TM):
    """(ReLU(a @ w1)) @ w2 + bias, fused conv4 + dueling head."""
    M, K = a.shape
    N1 = w1.shape[1]
    N2 = w2.shape[1]
    tm, m_pad = _choose_tiles(M, tm_cap)
    if m_pad != M:
        a = jnp.pad(a, ((0, m_pad - M), (0, 0)))
    n_tiles = m_pad // tm
    vmem = _vmem_limit(tm * K * 2, K * N1 * 2, N1 * N2 * 4, N2 * 4,
                       tm * N1 * 4, tm * N2 * 4)
    out = pl.pallas_call(
        _matmul_relu_matmul_bias_kernel,
        out_shape=jax.ShapeDtypeStruct((m_pad, N2), jnp.float32),
        grid=(n_tiles,),
        in_specs=[_a_spec(tm, K, n_tiles),
                  pl.BlockSpec((K, N1), lambda i: (0, 0)),
                  pl.BlockSpec((N1, N2), lambda i: (0, 0)),
                  pl.BlockSpec((1, N2), lambda i: (0, 0))],
        out_specs=pl.BlockSpec((tm, N2), lambda i: (i, 0)),
        compiler_params=pltpu.CompilerParams(
            dimension_semantics=("parallel",), vmem_limit_bytes=vmem),
    )(a, w1, w2, bias)
    return out[:M] if m_pad != M else out


# ------------------------------ glue (plain JAX) -----------------------------

def _conv_out(h, k, s):
    return (h - k) // s + 1


def _im2col(x_nhwc, k, stride):
    """Valid-conv patches -> (B*HO*WO, K*K*C) in (kh, kw, c) order."""
    # TODO(synk): move this into the Pallas kernel (implicit GEMM with a tap
    #             axis on the grid) to remove the patch materialization in HBM.
    B, H, W, C = x_nhwc.shape
    HO = _conv_out(H, k, stride)
    WO = _conv_out(W, k, stride)
    rows = []
    for di in range(k):
        cols = []
        for dj in range(k):
            cols.append(x_nhwc[:, di:di + (HO - 1) * stride + 1:stride,
                                  dj:dj + (WO - 1) * stride + 1:stride, :])
        rows.append(jnp.stack(cols, axis=3))      # (B, HO, WO, K, C)
    patches = jnp.stack(rows, axis=3)             # (B, HO, WO, K, K, C)
    return patches.reshape(B * HO * WO, k * k * C), HO, WO


def conv2d_relu(x_nhwc, w_mat, k, stride):
    """Bias-free valid conv + ReLU via Pallas matmul; output channels unpadded."""
    B = x_nhwc.shape[0]
    patches, HO, WO = _im2col(x_nhwc, k, stride)
    out = pallas_matmul_relu(patches, w_mat)          # (M, cout) bf16
    return out.reshape(B, HO, WO, w_mat.shape[1])


# ------------------------------ parameters -----------------------------------

def _kaiming_uniform(key, shape, fan_in):
    # PyTorch kaiming_uniform_(nonlinearity='relu'): bound = sqrt(2)*sqrt(3/fan_in)
    bound = float(jnp.sqrt(6.0 / fan_in))
    return jax.random.uniform(key, shape, jnp.float32, -bound, bound)


def init_dqn_params(key, n_actions, hidden, init_h, init_w):
    ks = jax.random.split(key, 6)
    p = {}
    p["conv1"] = _kaiming_uniform(ks[0], (32, 4, 8, 8), 4 * 8 * 8)
    p["conv2"] = _kaiming_uniform(ks[1], (64, 32, 4, 4), 32 * 4 * 4)
    p["conv3"] = _kaiming_uniform(ks[2], (64, 64, 3, 3), 64 * 3 * 3)
    p["conv4"] = _kaiming_uniform(ks[3], (hidden, 64, 7, 7), 64 * 7 * 7)

    # replicate DQN.__init__ probe: conv-stack shape math on a dummy input
    h, w = init_h, init_w
    for k, s in ((8, 4), (4, 2), (3, 1), (7, 1)):
        h, w = _conv_out(h, k, s), _conv_out(w, k, s)
    flat_dim = hidden * h * w
    split_size = flat_dim // 2

    p["adv_w"] = _kaiming_uniform(ks[4], (n_actions, split_size), split_size)
    p["adv_b"] = jnp.zeros((n_actions,), jnp.float32)
    p["val_w"] = _kaiming_uniform(ks[5], (1, split_size), split_size)
    p["val_b"] = jnp.zeros((1,), jnp.float32)
    return p, split_size


def prepare_dqn_params(params, n_actions, split_size):
    """One-time conversion into matmul operands (hoisted out of forward)."""
    def conv_w_to_mat(w_oihw, dtype):
        cout, cin, kh, kw = w_oihw.shape
        return (jnp.transpose(w_oihw, (2, 3, 1, 0))
                .reshape(kh * kw * cin, cout).astype(dtype))

    prep = {
        "conv_w": [conv_w_to_mat(params[n], jnp.bfloat16)
                   for n in ("conv1", "conv2", "conv3")],
        "conv4_w": conv_w_to_mat(params["conv4"], jnp.bfloat16),
    }

    hidden = params["conv4"].shape[0]
    flat_dim = 2 * split_size
    assert flat_dim == hidden, "fused head assumes conv4 output spatial == 1x1"
    # Fused dueling head, built once: cols [0:n_actions] = advantage head
    # (second half of features), col [n_actions] = value head (first half).
    # Kept in f32: the second matmul is tiny (K = hidden), full fidelity is free.
    w_head = jnp.zeros((hidden, n_actions + 1), jnp.float32)
    w_head = w_head.at[split_size:, :n_actions].set(params["adv_w"].T)
    w_head = w_head.at[:split_size, n_actions].set(params["val_w"][0])
    b_head = jnp.concatenate([params["adv_b"], params["val_b"]]).reshape(1, -1)
    prep["head_w"] = w_head
    prep["head_b"] = b_head.astype(jnp.float32)
    return prep


# ------------------------------ forward ---------------------------------------

def dqn_forward(prep, x_nchw, n_actions):
    x = jnp.transpose(x_nchw, (0, 2, 3, 1)).astype(jnp.bfloat16)   # NCHW -> NHWC
    for w_mat, (k, stride) in zip(prep["conv_w"], CONV_CFG):
        x = conv2d_relu(x, w_mat, k, stride)

    # conv4's 7x7 window over the 7x7 conv3 output reduces spatial to 1x1, so
    # its im2col is exactly the NHWC flatten in (kh, kw, c) order: plain reshape.
    B, HO, WO, C = x.shape
    # TODO(synk): generalize the conv4+head fusion to spatial extents > 1x1.
    assert HO * WO * C == prep["conv4_w"].shape[0]
    patches = x.reshape(B, HO * WO * C)

    out = pallas_matmul_relu_matmul_bias(patches, prep["conv4_w"],
                                         prep["head_w"], prep["head_b"])
    advantage = out[:, :n_actions]
    value = out[:, n_actions:n_actions + 1]
    return advantage, value


# ------------------------------ pure-JAX reference ----------------------------

def dqn_forward_ref(params, x_nchw, split_size):
    def conv(x, w, s):
        y = lax.conv_general_dilated(x, w, (s, s), "VALID",
                                     dimension_numbers=("NCHW", "OIHW", "NCHW"))
        return jnp.maximum(y, 0.0)

    x = conv(x_nchw, params["conv1"], 4)
    x = conv(x, params["conv2"], 2)
    x = conv(x, params["conv3"], 1)
    x = conv(x, params["conv4"], 1)
    flat = x.reshape(x.shape[0], -1)
    vs, advs = flat[:, :split_size], flat[:, split_size:]
    advantage = advs @ params["adv_w"].T + params["adv_b"]
    value = vs @ params["val_w"].T + params["val_b"]
    return advantage, value


# ------------------------------ main -------------------------------------------

if __name__ == "__main__":
    # 84x84 is the minimal spatial size the conv stack accepts
    # (84 -> 20 -> 9 -> 7 -> 1); batch=2, in-channels=4, hidden=32, 6 actions.
    B, C_IN, H, W = 2, 4, 84, 84
    N_ACTIONS, HIDDEN = 6, 32

    key = jax.random.PRNGKey(0)
    k_params, k_x = jax.random.split(key)
    params, split_size = init_dqn_params(k_params, N_ACTIONS, HIDDEN, H, W)
    prep = prepare_dqn_params(params, N_ACTIONS, split_size)
    x = jax.random.normal(k_x, (B, C_IN, H, W), jnp.float32)

    fwd = jax.jit(functools.partial(dqn_forward, n_actions=N_ACTIONS))
    advantage, value = fwd(prep, x)
    advantage = jax.block_until_ready(advantage)
    value = jax.block_until_ready(value)

    assert advantage.shape == (B, N_ACTIONS) and value.shape == (B, 1)
    assert bool(jnp.all(jnp.isfinite(advantage))) and bool(jnp.all(jnp.isfinite(value)))

    adv_ref, val_ref = dqn_forward_ref(params, x, split_size)
    assert jnp.allclose(advantage, adv_ref, rtol=5e-2, atol=5e-2), \
        float(jnp.max(jnp.abs(advantage - adv_ref)))
    assert jnp.allclose(value, val_ref, rtol=5e-2, atol=5e-2), \
        float(jnp.max(jnp.abs(value - val_ref)))

    print("KERNEL_OK")
</pallas_src>

<mosaic_0001>
module attributes {stable_mosaic.version = 11 : i64} {
  func.func @_matmul_relu_kernel(%arg0: i32, %arg1: memref<400x256xbf16, #tpu.memory_space<vmem>>, %arg2: memref<256x32xbf16, #tpu.memory_space<vmem>>, %arg3: memref<400x32xbf16, #tpu.memory_space<vmem>>) attributes {dimension_semantics = [#tpu.dimension_semantics<parallel>], iteration_bounds = array<i64: 2>, scalar_prefetch = 0 : i64, scratch_operands = 0 : i64, tpu.core_type = #tpu.core_type<tc>, window_params = [{transform_indices = @transform_0, window_bounds = array<i64: 400, 256>}, {pipeline_mode = #tpu.pipeline_mode<synchronous>, transform_indices = @transform_1, window_bounds = array<i64: 256, 32>}, {transform_indices = @transform_2, window_bounds = array<i64: 400, 32>}]} {
    %c0 = arith.constant 0 : index
    %c0_0 = arith.constant 0 : index
    %0 = vector.load %arg1[%c0, %c0_0] : memref<400x256xbf16, #tpu.memory_space<vmem>>, vector<400x256xbf16>
    %c0_1 = arith.constant 0 : index
    %c0_2 = arith.constant 0 : index
    %1 = vector.load %arg2[%c0_1, %c0_2] : memref<256x32xbf16, #tpu.memory_space<vmem>>, vector<256x32xbf16>
    %cst = arith.constant dense<0.000000e+00> : vector<400x32xf32>
    %2 = tpu.matmul %0, %1, %cst {dimension_numbers = #tpu.dot_dimension_numbers<[1], [0], [0], [1], [0, 0, 1, 1], [], []>} : vector<400x256xbf16>, vector<256x32xbf16>, vector<400x32xf32> -> vector<400x32xf32>
    %cst_3 = arith.constant 0.000000e+00 : f32
    %3 = vector.broadcast %cst_3 : f32 to vector<400x32xf32>
    %4 = arith.maximumf %2, %3 : vector<400x32xf32>
    %5 = arith.truncf %4 : vector<400x32xf32> to vector<400x32xbf16>
    %c0_4 = arith.constant 0 : index
    %c0_5 = arith.constant 0 : index
    %6 = vector.load %arg3[%c0_4, %c0_5] : memref<400x32xbf16, #tpu.memory_space<vmem>>, vector<400x32xbf16>
    tpu.vector_store %arg3[%c0_4, %c0_5], %5 {strides = array<i32>} : memref<400x32xbf16, #tpu.memory_space<vmem>>, vector<400x32xbf16>,
    return
  }
  func.func @transform_0(%arg0: i32) -> (i32, i32) {
    %c0_i32 = arith.constant 0 : i32
    %c0_i32_0 = arith.constant 0 : i32
    return %arg0, %c0_i32 : i32, i32
  }
  func.func @transform_1(%arg0: i32) -> (i32, i32) {
    %c0_i32 = arith.constant 0 : i32
    %c0_i32_0 = arith.constant 0 : i32
    %c0_i32_1 = arith.constant 0 : i32
    return %c0_i32, %c0_i32_0 : i32, i32
  }
  func.func @transform_2(%arg0: i32) -> (i32, i32) {
    %c0_i32 = arith.constant 0 : i32
    %c0_i32_0 = arith.constant 0 : i32
    return %arg0, %c0_i32 : i32, i32
  }
}

module attributes {stable_mosaic.version = 11 : i64} {
  func.func @_matmul_relu_kernel(%arg0: i32, %arg1: memref<96x512xbf16, #tpu.memory_space<vmem>>, %arg2: memref<512x64xbf16, #tpu.memory_space<vmem>>, %arg3: memref<96x64xbf16, #tpu.memory_space<vmem>>) attributes {dimension_semantics = [#tpu.dimension_semantics<parallel>], iteration_bounds = array<i64: 2>, scalar_prefetch = 0 : i64, scratch_operands = 0 : i64, tpu.core_type = #tpu.core_type<tc>, window_params = [{transform_indices = @transform_0, window_bounds = array<i64: 96, 512>}, {pipeline_mode = #tpu.pipeline_mode<synchronous>, transform_indices = @transform_1, window_bounds = array<i64: 512, 64>}, {transform_indices = @transform_2, window_bounds = array<i64: 96, 64>}]} {
    %c0 = arith.constant 0 : index
    %c0_0 = arith.constant 0 : index
    %0 = vector.load %arg1[%c0, %c0_0] : memref<96x512xbf16, #tpu.memory_space<vmem>>, vector<96x512xbf16>
    %c0_1 = arith.constant 0 : index
    %c0_2 = arith.constant 0 : index
    %1 = vector.load %arg2[%c0_1, %c0_2] : memref<512x64xbf16, #tpu.memory_space<vmem>>, vector<512x64xbf16>
    %cst = arith.constant dense<0.000000e+00> : vector<96x64xf32>
    %2 = tpu.matmul %0, %1, %cst {dimension_numbers = #tpu.dot_dimension_numbers<[1], [0], [0], [1], [0, 0, 1, 1], [], []>} : vector<96x512xbf16>, vector<512x64xbf16>, vector<96x64xf32> -> vector<96x64xf32>
    %cst_3 = arith.constant 0.000000e+00 : f32
    %3 = vector.broadcast %cst_3 : f32 to vector<96x64xf32>
    %4 = arith.maximumf %2, %3 : vector<96x64xf32>
    %5 = arith.truncf %4 : vector<96x64xf32> to vector<96x64xbf16>
    %c0_4 = arith.constant 0 : index
    %c0_5 = arith.constant 0 : index
    %6 = vector.load %arg3[%c0_4, %c0_5] : memref<96x64xbf16, #tpu.memory_space<vmem>>, vector<96x64xbf16>
    tpu.vector_store %arg3[%c0_4, %c0_5], %5 {strides = array<i32>} : memref<96x64xbf16, #tpu.memory_space<vmem>>, vector<96x64xbf16>,
    return
  }
  func.func @transform_0(%arg0: i32) -> (i32, i32) {
    %c0_i32 = arith.constant 0 : i32
    %c0_i32_0 = arith.constant 0 : i32
    return %arg0, %c0_i32 : i32, i32
  }
  func.func @transform_1(%arg0: i32) -> (i32, i32) {
    %c0_i32 = arith.constant 0 : i32
    %c0_i32_0 = arith.constant 0 : i32
    %c0_i32_1 = arith.constant 0 : i32
    return %c0_i32, %c0_i32_0 : i32, i32
  }
  func.func @transform_2(%arg0: i32) -> (i32, i32) {
    %c0_i32 = arith.constant 0 : i32
    %c0_i32_0 = arith.constant 0 : i32
    return %arg0, %c0_i32 : i32, i32
  }
}

module attributes {stable_mosaic.version = 11 : i64} {
  func.func @_matmul_relu_kernel(%arg0: i32, %arg1: memref<64x576xbf16, #tpu.memory_space<vmem>>, %arg2: memref<576x64xbf16, #tpu.memory_space<vmem>>, %arg3: memref<64x64xbf16, #tpu.memory_space<vmem>>) attributes {dimension_semantics = [#tpu.dimension_semantics<parallel>], iteration_bounds = array<i64: 2>, scalar_prefetch = 0 : i64, scratch_operands = 0 : i64, tpu.core_type = #tpu.core_type<tc>, window_params = [{transform_indices = @transform_0, window_bounds = array<i64: 64, 576>}, {pipeline_mode = #tpu.pipeline_mode<synchronous>, transform_indices = @transform_1, window_bounds = array<i64: 576, 64>}, {transform_indices = @transform_2, window_bounds = array<i64: 64, 64>}]} {
    %c0 = arith.constant 0 : index
    %c0_0 = arith.constant 0 : index
    %0 = vector.load %arg1[%c0, %c0_0] : memref<64x576xbf16, #tpu.memory_space<vmem>>, vector<64x576xbf16>
    %c0_1 = arith.constant 0 : index
    %c0_2 = arith.constant 0 : index
    %1 = vector.load %arg2[%c0_1, %c0_2] : memref<576x64xbf16, #tpu.memory_space<vmem>>, vector<576x64xbf16>
    %cst = arith.constant dense<0.000000e+00> : vector<64x64xf32>
    %2 = tpu.matmul %0, %1, %cst {dimension_numbers = #tpu.dot_dimension_numbers<[1], [0], [0], [1], [0, 0, 1, 1], [], []>} : vector<64x576xbf16>, vector<576x64xbf16>, vector<64x64xf32> -> vector<64x64xf32>
    %cst_3 = arith.constant 0.000000e+00 : f32
    %3 = vector.broadcast %cst_3 : f32 to vector<64x64xf32>
    %4 = arith.maximumf %2, %3 : vector<64x64xf32>
    %5 = arith.truncf %4 : vector<64x64xf32> to vector<64x64xbf16>
    %c0_4 = arith.constant 0 : index
    %c0_5 = arith.constant 0 : index
    %6 = vector.load %arg3[%c0_4, %c0_5] : memref<64x64xbf16, #tpu.memory_space<vmem>>, vector<64x64xbf16>
    tpu.vector_store %arg3[%c0_4, %c0_5], %5 {strides = array<i32>} : memref<64x64xbf16, #tpu.memory_space<vmem>>, vector<64x64xbf16>,
    return
  }
  func.func @transform_0(%arg0: i32) -> (i32, i32) {
    %c0_i32 = arith.constant 0 : i32
    %c0_i32_0 = arith.constant 0 : i32
    return %arg0, %c0_i32 : i32, i32
  }
  func.func @transform_1(%arg0: i32) -> (i32, i32) {
    %c0_i32 = arith.constant 0 : i32
    %c0_i32_0 = arith.constant 0 : i32
    %c0_i32_1 = arith.constant 0 : i32
    return %c0_i32, %c0_i32_0 : i32, i32
  }
  func.func @transform_2(%arg0: i32) -> (i32, i32) {
    %c0_i32 = arith.constant 0 : i32
    %c0_i32_0 = arith.constant 0 : i32
    return %arg0, %c0_i32 : i32, i32
  }
}

module attributes {stable_mosaic.version = 11 : i64} {
  func.func @_matmul_relu_matmul_bias_kernel(%arg0: i32, %arg1: memref<16x3136xbf16, #tpu.memory_space<vmem>>, %arg2: memref<3136x32xbf16, #tpu.memory_space<vmem>>, %arg3: memref<32x7xf32, #tpu.memory_space<vmem>>, %arg4: memref<1x7xf32, #tpu.memory_space<vmem>>, %arg5: memref<16x7xf32, #tpu.memory_space<vmem>>) attributes {dimension_semantics = [#tpu.dimension_semantics<parallel>], iteration_bounds = array<i64: 1>, scalar_prefetch = 0 : i64, scratch_operands = 0 : i64, tpu.core_type = #tpu.core_type<tc>, window_params = [{transform_indices = @transform_0, window_bounds = array<i64: 16, 3136>}, {pipeline_mode = #tpu.pipeline_mode<synchronous>, transform_indices = @transform_1, window_bounds = array<i64: 3136, 32>}, {pipeline_mode = #tpu.pipeline_mode<synchronous>, transform_indices = @transform_2, window_bounds = array<i64: 32, 7>}, {pipeline_mode = #tpu.pipeline_mode<synchronous>, transform_indices = @transform_3, window_bounds = array<i64: 1, 7>}, {transform_indices = @transform_4, window_bounds = array<i64: 16, 7>}]} {
    %c0 = arith.constant 0 : index
    %c0_0 = arith.constant 0 : index
    %0 = vector.load %arg1[%c0, %c0_0] : memref<16x3136xbf16, #tpu.memory_space<vmem>>, vector<16x3136xbf16>
    %c0_1 = arith.constant 0 : index
    %c0_2 = arith.constant 0 : index
    %1 = vector.load %arg2[%c0_1, %c0_2] : memref<3136x32xbf16, #tpu.memory_space<vmem>>, vector<3136x32xbf16>
    %cst = arith.constant dense<0.000000e+00> : vector<16x32xf32>
    %2 = tpu.matmul %0, %1, %cst {dimension_numbers = #tpu.dot_dimension_numbers<[1], [0], [0], [1], [0, 0, 1, 1], [], []>} : vector<16x3136xbf16>, vector<3136x32xbf16>, vector<16x32xf32> -> vector<16x32xf32>
    %cst_3 = arith.constant 0.000000e+00 : f32
    %3 = vector.broadcast %cst_3 : f32 to vector<16x32xf32>
    %4 = arith.maximumf %2, %3 : vector<16x32xf32>
    %c0_4 = arith.constant 0 : index
    %c0_5 = arith.constant 0 : index
    %5 = vector.load %arg3[%c0_4, %c0_5] : memref<32x7xf32, #tpu.memory_space<vmem>>, vector<32x7xf32>
    %cst_6 = arith.constant dense<0.000000e+00> : vector<16x7xf32>
    %6 = tpu.matmul %4, %5, %cst_6 {dimension_numbers = #tpu.dot_dimension_numbers<[1], [0], [0], [1], [0, 0, 1, 1], [], []>} : vector<16x32xf32>, vector<32x7xf32>, vector<16x7xf32> -> vector<16x7xf32>
    %c0_7 = arith.constant 0 : index
    %c0_8 = arith.constant 0 : index
    %7 = vector.load %arg4[%c0_7, %c0_8] : memref<1x7xf32, #tpu.memory_space<vmem>>, vector<1x7xf32>
    %8 = vector.broadcast %7 : vector<1x7xf32> to vector<16x7xf32>
    %9 = arith.addf %6, %8 : vector<16x7xf32>
    %c0_9 = arith.constant 0 : index
    %c0_10 = arith.constant 0 : index
    %10 = vector.load %arg5[%c0_9, %c0_10] : memref<16x7xf32, #tpu.memory_space<vmem>>, vector<16x7xf32>
    tpu.vector_store %arg5[%c0_9, %c0_10], %9 {strides = array<i32>} : memref<16x7xf32, #tpu.memory_space<vmem>>, vector<16x7xf32>,
    return
  }
  func.func @transform_0(%arg0: i32) -> (i32, i32) {
    %c0_i32 = arith.constant 0 : i32
    %c0_i32_0 = arith.constant 0 : i32
    return %arg0, %c0_i32 : i32, i32
  }
  func.func @transform_1(%arg0: i32) -> (i32, i32) {
    %c0_i32 = arith.constant 0 : i32
    %c0_i32_0 = arith.constant 0 : i32
    %c0_i32_1 = arith.constant 0 : i32
    return %c0_i32, %c0_i32_0 : i32, i32
  }
  func.func @transform_2(%arg0: i32) -> (i32, i32) {
    %c0_i32 = arith.constant 0 : i32
    %c0_i32_0 = arith.constant 0 : i32
    %c0_i32_1 = arith.constant 0 : i32
    return %c0_i32, %c0_i32_0 : i32, i32
  }
  func.func @transform_3(%arg0: i32) -> (i32, i32) {
    %c0_i32 = arith.constant 0 : i32
    %c0_i32_0 = arith.constant 0 : i32
    %c0_i32_1 = arith.constant 0 : i32
    return %c0_i32, %c0_i32_0 : i32, i32
  }
  func.func @transform_4(%arg0: i32) -> (i32, i32) {
    %c0_i32 = arith.constant 0 : i32
    %c0_i32_0 = arith.constant 0 : i32
    return %arg0, %c0_i32 : i32, i32
  }
}

</mosaic_0001>

<bundles_post_ra>
// kernel: dqn_forward.4
= control target key start
LH: loop header
LB: loop body
LE: loop exit
PB: predicated region body
PF: predicated region fallthrough
CT: control target
= control target key end

     0   :  { %s1441_s9 = smov 0   ;;  %s1720_s0 = inlined_call_operand.vmem [shape: bf16[800,256], index: 0, kind: input, shape index: {}]   ;;  %s1721_s1 = inlined_call_operand.vmem [shape: bf16[256,32], index: 1, kind: input, shape index: {}]   ;;  %s1722_s2 = inlined_call_operand.vmem [shape: bf16[800,32], index: 2, kind: output, shape index: {}]  }
   0x1 LB: > { %s1053_s10 = sadd.s32 4294967295, %s1424_s9   ;;  %p1057_p0 = scmp.ge.s32.totalorder %s1424_s9, 1  ;;  %s1424_s9 = sphi %s1441_s9, %s12_s9  }
   0x2   : > { %p114_p1 = scmp.lt.s32.totalorder %s1424_s9, 3 }
   0x4   : > { %p115_p2 = pnand %p1057_p0, %p114_p1 }
   0x5   : > { %s137_s23 = smul.u32 (!%p115_p2), 50, %s1053_s10 }
   0x6   : > { %118 = sbr.rel (%p115_p2) target bundleno = 382 (0x17e), region = 28 }
   0x7   : > { %p138_p3 = scmp.lt.s32.totalorder (!%p115_p2), %s137_s23, 99 }
   0xb   : > { %v1385_v0 = vld [vmem:[%s1721_s1 + $0x38] sm:$0xff]  ;;  %v1384_v2 = vld [vmem:[%s1721_s1 + $0x30] sm:$0xff]  ;;  %v1383_v4 = vld [vmem:[%s1721_s1 + $0x28] sm:$0xff]  ;;  %s1724_s23 = smov (!%p138_p3, %s137_s23), 99  ;;  %vm946_vm0 = vcmask 257024  }
   0xc   : > { %v1393_v1 = vld [vmem:[%s1721_s1 + $0x78] sm:$0xff]  ;;  %578 = vmatpush.bf16.msra.mxu0 %v1385_v0  ;;  %1394 = vmatpush.bf16.msra.mxu2 %v1385_v0  ;;  %v1392_v3 = vld [vmem:[%s1721_s1 + $0x70] sm:$0xff]  ;;  %v1391_v5 = vld [vmem:[%s1721_s1 + $0x68] sm:$0xff]  ;;  %s1327_s8 = sshll.u32 %s1724_s23, 3  ;;  %s1060_s21 = sshll.u32 %s1724_s23, 2 }
   0xd   : > { %712 = vmatpush.bf16.msra.mxu1 %v1393_v1  ;;  %1402 = vmatpush.bf16.msra.mxu3 %v1393_v1  ;;  %v1382_v6 = vld [vmem:[%s1721_s1 + $0x20] sm:$0xff]  ;;  %v1381_v8 = vld [vmem:[%s1721_s1 + $0x18] sm:$0xff]  ;;  %v1380_v10 = vld [vmem:[%s1721_s1 + $0x10] sm:$0xff]  ;;  %s1494_s14 = scalar_lea.vmem %s1720_s0, %s1327_s8  ;;  %s1581_s25 = scalar_lea.vmem %s1722_s2, %s1060_s21 }
   0xe   : > { %v1390_v7 = vld [vmem:[%s1721_s1 + $0x60] sm:$0xff]  ;;  %v1389_v9 = vld [vmem:[%s1721_s1 + $0x58] sm:$0xff]  ;;  %v1388_v11 = vld [vmem:[%s1721_s1 + $0x50] sm:$0xff] }
   0xf   : > { %v1379_v12 = vld [vmem:[%s1721_s1 + $0x8] sm:$0xff]  ;;  %v1378_v14 = vld [vmem:[%s1721_s1] sm:$0xff]  ;;  %v1354_v22 = vld [vmem:[%s1494_s14 + $0xd4] sm:$0xf] }
  0x10   : > { %579 = vmatpush.bf16.msra.mxu0 %v1384_v2  ;;  %1395 = vmatpush.bf16.msra.mxu2 %v1384_v2  ;;  %v1387_v13 = vld [vmem:[%s1721_s1 + $0x48] sm:$0xff]  ;;  %v1386_v15 = vld [vmem:[%s1721_s1 + $0x40] sm:$0xff]  ;;  %v1169_v23 = vld [vmem:[%s1494_s14 + $0xd8] sm:$0xf0] }
  0x11   : > { %713 = vmatpush.bf16.msra.mxu1 %v1392_v3  ;;  %1403 = vmatpush.bf16.msra.mxu3 %v1392_v3  ;;  %v1063_v16 = vld [vmem:[%s1494_s14] sm:$0xf]  ;;  %v1329_v17 = vld [vmem:[%s1494_s14 + $0x4] sm:$0xf0]  ;;  %v1328_v20 = vld [vmem:[%s1494_s14 + $0x4] sm:$0xf]  ;;  %v1172_v27 = vor.u32 %v1354_v22, %v1169_v23 }
  0x12   : > { %v1159_v18 = vld [vmem:[%s1494_s14 + $0xc0] sm:$0xf]  ;;  %v1353_v19 = vld [vmem:[%s1494_s14 + $0xc4] sm:$0xf0]  ;;  %v1065_v21 = vld [vmem:[%s1494_s14 + $0x8] sm:$0xf0]  ;;  %v1064_v24 = vor.u32 %v1329_v17, %v1063_v16 }
  0x13   : > { %v1160_v25 = vor.u32 %v1353_v19, %v1159_v18  ;;  %v1068_v26 = vor.u32 %v1328_v20, %v1065_v21  ;;  %v1071_v28 = vld [vmem:[%s1494_s14 + $0x10] sm:$0xf]  ;;  %v1331_v29 = vld [vmem:[%s1494_s14 + $0x14] sm:$0xf0]  ;;  %v1330_v32 = vld [vmem:[%s1494_s14 + $0x14] sm:$0xf] }
  0x14   : > { %580 = vmatpush.bf16.msra.mxu0 %v1383_v4  ;;  %1396 = vmatpush.bf16.msra.mxu2 %v1383_v4  ;;  %v1167_v30 = vld [vmem:[%s1494_s14 + $0xd0] sm:$0xf]  ;;  %v1355_v31 = vld [vmem:[%s1494_s14 + $0xd4] sm:$0xf0]  ;;  %v1073_v33 = vld [vmem:[%s1494_s14 + $0x18] sm:$0xf0]  ;;  %v1072_v36 = vor.u32 %v1331_v29, %v1071_v28 }
  0x15   : > { %714 = vmatpush.bf16.msra.mxu1 %v1391_v5  ;;  %1404 = vmatpush.bf16.msra.mxu3 %v1391_v5  ;;  %v1356_v34 = vld [vmem:[%s1494_s14 + $0xe4] sm:$0xf]  ;;  %v1177_v35 = vld [vmem:[%s1494_s14 + $0xe8] sm:$0xf0]  ;;  %v1168_v37 = vor.u32 %v1355_v31, %v1167_v30  ;;  %v1076_v38 = vor.u32 %v1330_v32, %v1073_v33  ;;  %v1079_v40 = vld [vmem:[%s1494_s14 + $0x20] sm:$0xf] }
  0x16   : > { %v1180_v39 = vor.u32 %v1356_v34, %v1177_v35  ;;  %v1333_v41 = vld [vmem:[%s1494_s14 + $0x24] sm:$0xf0]  ;;  %v1175_v42 = vld [vmem:[%s1494_s14 + $0xe0] sm:$0xf]  ;;  %v1332_v44 = vld [vmem:[%s1494_s14 + $0x24] sm:$0xf] }
  0x17   : > { %v1357_v43 = vld [vmem:[%s1494_s14 + $0xe4] sm:$0xf0]  ;;  %v1081_v45 = vld [vmem:[%s1494_s14 + $0x28] sm:$0xf0]  ;;  %v1358_v46 = vld [vmem:[%s1494_s14 + $0xf4] sm:$0xf]  ;;  %v1080_v48 = vor.u32 %v1333_v41, %v1079_v40 }
  0x18   : > { %581 = vmatpush.bf16.msra.mxu0 %v1382_v6  ;;  %1397 = vmatpush.bf16.msra.mxu2 %v1382_v6  ;;  %v1185_v47 = vld [vmem:[%s1494_s14 + $0xf8] sm:$0xf0]  ;;  %v1176_v49 = vor.u32 %v1357_v43, %v1175_v42  ;;  %v1084_v50 = vor.u32 %v1332_v44, %v1081_v45  ;;  %v1087_v52 = vld [vmem:[%s1494_s14 + $0x30] sm:$0xf]  ;;  %v1335_v53 = vld [vmem:[%s1494_s14 + $0x34] sm:$0xf0] }
  0x19   : > { %715 = vmatpush.bf16.msra.mxu1 %v1390_v7  ;;  %1405 = vmatpush.bf16.msra.mxu3 %v1390_v7  ;;  %v1188_v51 = vor.u32 %v1358_v46, %v1185_v47  ;;  %v1183_v54 = vld [vmem:[%s1494_s14 + $0xf0] sm:$0xf]  ;;  %v1359_v55 = vld [vmem:[%s1494_s14 + $0xf4] sm:$0xf0]  ;;  %v1334_v56 = vld [vmem:[%s1494_s14 + $0x34] sm:$0xf]  ;;  %v1088_v60 = vor.u32 %v1335_v53, %v1087_v52 }
  0x1a   : > { %v1089_v57 = vld [vmem:[%s1494_s14 + $0x38] sm:$0xf0]  ;;  %v1360_v58 = vld [vmem:[%s1494_s14 + $0x104] sm:$0xf]  ;;  %v1193_v59 = vld [vmem:[%s1494_s14 + $0x108] sm:$0xf0]  ;;  %v1184_v61 = vor.u32 %v1359_v55, %v1183_v54 }
  0x1b   : > { %v1092_v62 = vor.u32 %v1334_v56, %v1089_v57  ;;  %v1196_v63 = vor.u32 %v1360_v58, %v1193_v59  ;;  %v1095_v0 = vld [vmem:[%s1494_s14 + $0x40] sm:$0xf]  ;;  %v1337_v1 = vld [vmem:[%s1494_s14 + $0x44] sm:$0xf0]  ;;  %v1336_v4 = vld [vmem:[%s1494_s14 + $0x44] sm:$0xf] }
  0x1c   : > { %582 = vmatpush.bf16.msra.mxu0 %v1381_v8  ;;  %1398 = vmatpush.bf16.msra.mxu2 %v1381_v8  ;;  %v1191_v2 = vld [vmem:[%s1494_s14 + $0x100] sm:$0xf]  ;;  %v1361_v3 = vld [vmem:[%s1494_s14 + $0x104] sm:$0xf0]  ;;  %v1097_v5 = vld [vmem:[%s1494_s14 + $0x48] sm:$0xf0]  ;;  %v1096_v8 = vor.u32 %v1337_v1, %v1095_v0 }
  0x1d   : > { %716 = vmatpush.bf16.msra.mxu1 %v1389_v9  ;;  %1406 = vmatpush.bf16.msra.mxu3 %v1389_v9  ;;  %v1362_v6 = vld [vmem:[%s1494_s14 + $0x114] sm:$0xf]  ;;  %v1201_v7 = vld [vmem:[%s1494_s14 + $0x118] sm:$0xf0]  ;;  %v1192_v9 = vor.u32 %v1361_v3, %v1191_v2  ;;  %v1364_v18 = vld [vmem:[%s1494_s14 + $0x124] sm:$0xf] }
  0x1e   : > { %v1338_v16 = vld [vmem:[%s1494_s14 + $0x54] sm:$0xf]  ;;  %v1105_v17 = vld [vmem:[%s1494_s14 + $0x58] sm:$0xf0]  ;;  %v1209_v19 = vld [vmem:[%s1494_s14 + $0x128] sm:$0xf0] }
  0x1f   : > { %v1108_v22 = vor.u32 %v1338_v16, %v1105_v17  ;;  %v1212_v23 = vor.u32 %v1364_v18, %v1209_v19  ;;  %v1340_v28 = vld [vmem:[%s1494_s14 + $0x64] sm:$0xf]  ;;  %v1113_v29 = vld [vmem:[%s1494_s14 + $0x68] sm:$0xf0]  ;;  %v1366_v30 = vld [vmem:[%s1494_s14 + $0x134] sm:$0xf] }
  0x20   : > { %583 = vmatpush.bf16.msra.mxu0 %v1380_v10  ;;  %1399 = vmatpush.bf16.msra.mxu2 %v1380_v10  ;;  %v1100_v10 = vor.u32 %v1336_v4, %v1097_v5  ;;  %v1217_v31 = vld [vmem:[%s1494_s14 + $0x138] sm:$0xf0]  ;;  %v1116_v34 = vor.u32 %v1340_v28, %v1113_v29  ;;  %v1342_v40 = vld [vmem:[%s1494_s14 + $0x74] sm:$0xf]  ;;  %v1368_v42 = vld [vmem:[%s1494_s14 + $0x144] sm:$0xf] }
  0x21   : > { %717 = vmatpush.bf16.msra.mxu1 %v1388_v11  ;;  %1407 = vmatpush.bf16.msra.mxu3 %v1388_v11  ;;  %v1204_v11 = vor.u32 %v1362_v6, %v1201_v7  ;;  %v1220_v35 = vor.u32 %v1366_v30, %v1217_v31  ;;  %v1121_v41 = vld [vmem:[%s1494_s14 + $0x78] sm:$0xf0]  ;;  %v1225_v43 = vld [vmem:[%s1494_s14 + $0x148] sm:$0xf0]  ;;  %v1344_v52 = vld [vmem:[%s1494_s14 + $0x84] sm:$0xf] }
  0x22   : > { %v1124_v46 = vor.u32 %v1342_v40, %v1121_v41  ;;  %v1228_v47 = vor.u32 %v1368_v42, %v1225_v43  ;;  %v1129_v53 = vld [vmem:[%s1494_s14 + $0x88] sm:$0xf0]  ;;  %v1370_v54 = vld [vmem:[%s1494_s14 + $0x154] sm:$0xf]  ;;  %v1233_v55 = vld [vmem:[%s1494_s14 + $0x158] sm:$0xf0] }
  0x23   : > { %v1132_v59 = vor.u32 %v1344_v52, %v1129_v53  ;;  %v1135_v6 = vld [vmem:[%s1494_s14 + $0x90] sm:$0xf]  ;;  %v1347_v7 = vld [vmem:[%s1494_s14 + $0x94] sm:$0xf0]  ;;  %v1348_v40 = vld [vmem:[%s1494_s14 + $0xa4] sm:$0xf] }
  0x24   : > { %584 = vmatpush.bf16.msra.mxu0 %v1379_v12  ;;  %1400 = vmatpush.bf16.msra.mxu2 %v1379_v12  ;;  %v1103_v12 = vld [vmem:[%s1494_s14 + $0x50] sm:$0xf]  ;;  %v1136_v17 = vor.u32 %v1347_v7, %v1135_v6  ;;  %v1145_v41 = vld [vmem:[%s1494_s14 + $0xa8] sm:$0xf0]  ;;  %v1374_v42 = vld [vmem:[%s1494_s14 + $0x174] sm:$0xf] }
  0x25   : > { %718 = vmatpush.bf16.msra.mxu1 %v1387_v13  ;;  %1408 = vmatpush.bf16.msra.mxu3 %v1387_v13  ;;  %v1339_v13 = vld [vmem:[%s1494_s14 + $0x54] sm:$0xf0]  ;;  %v1249_v43 = vld [vmem:[%s1494_s14 + $0x178] sm:$0xf0]  ;;  %v1247_v6 = vld [vmem:[%s1494_s14 + $0x170] sm:$0xf] }
  0x26   : > { %v1104_v20 = vor.u32 %v1339_v13, %v1103_v12  ;;  %v1137_v12 = vld [vmem:[%s1494_s14 + $0x98] sm:$0xf0]  ;;  %v1372_v13 = vld [vmem:[%s1494_s14 + $0x164] sm:$0xf]  ;;  %v1252_v52 = vor.u32 %v1374_v42, %v1249_v43  ;;  %v1375_v7 = vld [vmem:[%s1494_s14 + $0x174] sm:$0xf0] }
  0x28   : > { %585 = vmatpush.bf16.msra.mxu0 %v1378_v14  ;;  %1401 = vmatpush.bf16.msra.mxu2 %v1378_v14  ;;  %v1199_v14 = vld [vmem:[%s1494_s14 + $0x110] sm:$0xf] }
  0x29   : > { %719 = vmatpush.bf16.msra.mxu1 %v1386_v15  ;;  %1409 = vmatpush.bf16.msra.mxu3 %v1386_v15  ;;  %v1363_v15 = vld [vmem:[%s1494_s14 + $0x114] sm:$0xf0] }
  0x2a   : > { %v1200_v21 = vor.u32 %v1363_v15, %v1199_v14  ;;  %v1241_v14 = vld [vmem:[%s1494_s14 + $0x168] sm:$0xf0] }
  0x2b   : > { %586 = vmatmul.bf16.vlgmr.msra.gmra.mxu0 %v1064_v24  ;;  %646 = vmatmul.bf16.vlgmr.msra.gmra.mxu2 %v1160_v25  ;;  %v1111_v24 = vld [vmem:[%s1494_s14 + $0x60] sm:$0xf]  ;;  %v1341_v25 = vld [vmem:[%s1494_s14 + $0x64] sm:$0xf0] }
  0x2c   : > { %720 = vmatmul.bf16.vlgmr.msra.gmra.mxu1 %v1068_v26  ;;  %785 = vmatmul.bf16.vlgmr.msra.gmra.mxu3 %v1172_v27  ;;  %v1207_v26 = vld [vmem:[%s1494_s14 + $0x120] sm:$0xf]  ;;  %v1365_v27 = vld [vmem:[%s1494_s14 + $0x124] sm:$0xf0]  ;;  %v1112_v32 = vor.u32 %v1341_v25, %v1111_v24 }
  0x2d   : > { %v1208_v33 = vor.u32 %v1365_v27, %v1207_v26 }
  0x3b   : > { %591 = vmatmul.bf16.gmra.mxu0 %v1072_v36  ;;  %651 = vmatmul.bf16.gmra.mxu2 %v1168_v37  ;;  %v1119_v36 = vld [vmem:[%s1494_s14 + $0x70] sm:$0xf]  ;;  %v1343_v37 = vld [vmem:[%s1494_s14 + $0x74] sm:$0xf0] }
  0x3c   : > { %725 = vmatmul.bf16.gmra.mxu1 %v1076_v38  ;;  %790 = vmatmul.bf16.gmra.mxu3 %v1180_v39  ;;  %v1215_v38 = vld [vmem:[%s1494_s14 + $0x130] sm:$0xf]  ;;  %v1367_v39 = vld [vmem:[%s1494_s14 + $0x134] sm:$0xf0]  ;;  %v1120_v44 = vor.u32 %v1343_v37, %v1119_v36  ;;  %v1349_v36 = vld [vmem:[%s1494_s14 + $0xa4] sm:$0xf0] }
  0x3d   : > { %v1216_v45 = vor.u32 %v1367_v39, %v1215_v38  ;;  %v1239_v37 = vld [vmem:[%s1494_s14 + $0x160] sm:$0xf]  ;;  %v1373_v38 = vld [vmem:[%s1494_s14 + $0x164] sm:$0xf0] }
  0x4b   : > { %596 = vmatmul.bf16.gmra.mxu0 %v1080_v48  ;;  %656 = vmatmul.bf16.gmra.mxu2 %v1176_v49  ;;  %v1127_v48 = vld [vmem:[%s1494_s14 + $0x80] sm:$0xf]  ;;  %v1345_v49 = vld [vmem:[%s1494_s14 + $0x84] sm:$0xf0] }
  0x4c   : > { %730 = vmatmul.bf16.gmra.mxu1 %v1084_v50  ;;  %795 = vmatmul.bf16.gmra.mxu3 %v1188_v51  ;;  %v1223_v50 = vld [vmem:[%s1494_s14 + $0x140] sm:$0xf]  ;;  %v1369_v51 = vld [vmem:[%s1494_s14 + $0x144] sm:$0xf0]  ;;  %v1128_v56 = vor.u32 %v1345_v49, %v1127_v48  ;;  %v1240_v48 = vor.u32 %v1373_v38, %v1239_v37 }
  0x4d   : > { %v1224_v57 = vor.u32 %v1369_v51, %v1223_v50  ;;  %v1148_v51 = vor.u32 %v1348_v40, %v1145_v41  ;;  %v1255_v38 = vld [vmem:[%s1494_s14 + $0x180] sm:$0xf]  ;;  %v1352_v40 = vld [vmem:[%s1494_s14 + $0xc4] sm:$0xf]  ;;  %v1161_v41 = vld [vmem:[%s1494_s14 + $0xc8] sm:$0xf0] }
  0x5b   : > { %601 = vmatmul.bf16.gmra.mxu0 %v1088_v60  ;;  %661 = vmatmul.bf16.gmra.mxu2 %v1184_v61  ;;  %v1236_v60 = vor.u32 %v1370_v54, %v1233_v55 }
  0x5c   : > { %735 = vmatmul.bf16.gmra.mxu1 %v1092_v62  ;;  %800 = vmatmul.bf16.gmra.mxu3 %v1196_v63 }
  0x6b   : > { %606 = vmatmul.bf16.gmra.mxu0 %v1096_v8  ;;  %666 = vmatmul.bf16.gmra.mxu2 %v1192_v9  ;;  %v1231_v8 = vld [vmem:[%s1494_s14 + $0x150] sm:$0xf] }
  0x6c   : > { %740 = vmatmul.bf16.gmra.mxu1 %v1100_v10  ;;  %805 = vmatmul.bf16.gmra.mxu3 %v1204_v11  ;;  %v1371_v10 = vld [vmem:[%s1494_s14 + $0x154] sm:$0xf0]  ;;  %v1346_v11 = vld [vmem:[%s1494_s14 + $0x94] sm:$0xf] }
  0x6d   : > { %v1232_v18 = vor.u32 %v1371_v10, %v1231_v8  ;;  %v1153_v10 = vld [vmem:[%s1494_s14 + $0xb8] sm:$0xf0] }
  0x7b   : > { %611 = vmatmul.bf16.gmra.mxu0 %v1104_v20  ;;  %671 = vmatmul.bf16.gmra.mxu2 %v1200_v21  ;;  %v1140_v21 = vor.u32 %v1346_v11, %v1137_v12  ;;  %v1376_v11 = vld [vmem:[%s1494_s14 + $0x184] sm:$0xf]  ;;  %v1257_v12 = vld [vmem:[%s1494_s14 + $0x188] sm:$0xf0] }
  0x7c   : > { %745 = vmatmul.bf16.gmra.mxu1 %v1108_v22  ;;  %810 = vmatmul.bf16.gmra.mxu3 %v1212_v23  ;;  %v1244_v22 = vor.u32 %v1372_v13, %v1241_v14 }
  0x8b   : > { %616 = vmatmul.bf16.gmra.mxu0 %v1112_v32  ;;  %676 = vmatmul.bf16.gmra.mxu2 %v1208_v33 }
  0x8c   : > { %750 = vmatmul.bf16.gmra.mxu1 %v1116_v34  ;;  %815 = vmatmul.bf16.gmra.mxu3 %v1220_v35  ;;  %v1143_v34 = vld [vmem:[%s1494_s14 + $0xa0] sm:$0xf] }
  0x9b   : > { %621 = vmatmul.bf16.gmra.mxu0 %v1120_v44  ;;  %681 = vmatmul.bf16.gmra.mxu2 %v1216_v45 }
  0x9c   : > { %755 = vmatmul.bf16.gmra.mxu1 %v1124_v46  ;;  %820 = vmatmul.bf16.gmra.mxu3 %v1228_v47  ;;  %v1144_v47 = vor.u32 %v1349_v36, %v1143_v34 }
  0xa8   : > { %v587_v58 = vpop.f32.mrf.mxu0 }
  0xa9   : > { %v721_v61 = vpop.f32.mrf.mxu1 }
  0xaa   : > { %v722_v62 = vadd.f32 %v721_v61, %v587_v58 }
  0xab   : > { %626 = vmatmul.bf16.gmra.mxu0 %v1128_v56  ;;  %686 = vmatmul.bf16.gmra.mxu2 %v1224_v57 }
  0xac   : > { %v846_v63 = vmax.f32 %v722_v62, 0.0  ;;  %760 = vmatmul.bf16.gmra.mxu1 %v1132_v59  ;;  %825 = vmatmul.bf16.gmra.mxu3 %v1236_v60 }
  0xae   : > { %v896_v0 = vpack.c.bf16 %v846_v63, %v846_v63  ;;  %v1583_v1 = vpop.f32.mrf.mxu2 }
  0xaf   : > { %v786_v2 = vpop.f32.mrf.mxu3 }
  0xb0   : > { %947 = vst.msk [vmem:[%s1581_s25] sm:$0xf] %vm946_vm0, %v896_v0  ;;  %v589_v3 = vpop.f32.mrf.mxu0 }
  0xb1   : > { %v723_v4 = vpop.f32.mrf.mxu1 }
  0xb2   : > { %v724_v5 = vadd.f32 %v723_v4, %v589_v3  ;;  %v1151_v3 = vld [vmem:[%s1494_s14 + $0xb0] sm:$0xf] }
  0xb4   : > { %v847_v9 = vmax.f32 %v724_v5, 0.0  ;;  %v1351_v5 = vld [vmem:[%s1494_s14 + $0xb4] sm:$0xf0] }
  0xb6   : > { %v897_v15 = vpack.c.bf16 %v847_v9, %v847_v9  ;;  %v1595_v16 = vpop.f32.mrf.mxu2  ;;  %v1350_v9 = vld [vmem:[%s1494_s14 + $0xb4] sm:$0xf] }
  0xb7   : > { %v788_v19 = vpop.f32.mrf.mxu3 }
  0xb8   : > { %948 = vst.msk [vmem:[%s1581_s25 + $0x4] sm:$0xf] %vm946_vm0, %v897_v15  ;;  %v592_v20 = vpop.f32.mrf.mxu0 }
  0xb9   : > { %v726_v23 = vpop.f32.mrf.mxu1 }
  0xba   : > { %v727_v24 = vadd.f32 %v726_v23, %v592_v20 }
  0xbb   : > { %631 = vmatmul.bf16.gmra.mxu0 %v1136_v17  ;;  %691 = vmatmul.bf16.gmra.mxu2 %v1232_v18  ;;  %v1152_v17 = vor.u32 %v1351_v5, %v1151_v3  ;;  %v1248_v18 = vor.u32 %v1375_v7, %v1247_v6 }
  0xbc   : > { %v848_v25 = vmax.f32 %v727_v24, 0.0  ;;  %765 = vmatmul.bf16.gmra.mxu1 %v1140_v21  ;;  %830 = vmatmul.bf16.gmra.mxu3 %v1244_v22  ;;  %v1156_v21 = vor.u32 %v1350_v9, %v1153_v10  ;;  %v1260_v22 = vor.u32 %v1376_v11, %v1257_v12 }
  0xbe   : > { %v898_v26 = vpack.c.bf16 %v848_v25, %v848_v25  ;;  %v652_v27 = vpop.f32.mrf.mxu2 }
  0xbf   : > { %v787_v28 = vadd.f32 %v786_v2, %v652_v27  ;;  %v791_v29 = vpop.f32.mrf.mxu3 }
  0xc0   : > { %949 = vst.msk [vmem:[%s1581_s25 + $0x8] sm:$0xf] %vm946_vm0, %v898_v26  ;;  %v594_v30 = vpop.f32.mrf.mxu0 }
  0xc1   : > { %v872_v31 = vmax.f32 %v787_v28, 0.0  ;;  %v728_v32 = vpop.f32.mrf.mxu1 }
  0xc2   : > { %v729_v33 = vadd.f32 %v728_v32, %v594_v30 }
  0xc3   : > { %v922_v35 = vpack.c.bf16 %v872_v31, %v872_v31 }
  0xc4   : > { %v849_v39 = vmax.f32 %v729_v33, 0.0 }
  0xc5   : > { %973 = vst.msk [vmem:[%s1581_s25 + $0x68] sm:$0xf] %vm946_vm0, %v922_v35 }
  0xc6   : > { %v899_v44 = vpack.c.bf16 %v849_v39, %v849_v39  ;;  %v654_v45 = vpop.f32.mrf.mxu2  ;;  %v1377_v39 = vld [vmem:[%s1494_s14 + $0x184] sm:$0xf0] }
  0xc7   : > { %v789_v46 = vadd.f32 %v788_v19, %v654_v45  ;;  %v793_v49 = vpop.f32.mrf.mxu3  ;;  %v1256_v45 = vor.u32 %v1377_v39, %v1255_v38 }
  0xc8   : > { %950 = vst.msk [vmem:[%s1581_s25 + $0xc] sm:$0xf] %vm946_vm0, %v899_v44  ;;  %v597_v50 = vpop.f32.mrf.mxu0 }
  0xc9   : > { %v873_v53 = vmax.f32 %v789_v46, 0.0  ;;  %v731_v54 = vpop.f32.mrf.mxu1 }
  0xca   : > { %v732_v55 = vadd.f32 %v731_v54, %v597_v50 }
  0xcb   : > { %v923_v56 = vpack.c.bf16 %v873_v53, %v873_v53  ;;  %636 = vmatmul.bf16.gmra.mxu0 %v1144_v47  ;;  %696 = vmatmul.bf16.gmra.mxu2 %v1240_v48  ;;  %v1164_v48 = vor.u32 %v1352_v40, %v1161_v41 }
  0xcc   : > { %v850_v57 = vmax.f32 %v732_v55, 0.0  ;;  %770 = vmatmul.bf16.gmra.mxu1 %v1148_v51  ;;  %835 = vmatmul.bf16.gmra.mxu3 %v1252_v52 }
  0xcd   : > { %974 = vst.msk [vmem:[%s1581_s25 + $0x6c] sm:$0xf] %vm946_vm0, %v923_v56 }
  0xce   : > { %v900_v58 = vpack.c.bf16 %v850_v57, %v850_v57  ;;  %v657_v59 = vpop.f32.mrf.mxu2 }
  0xcf   : > { %v792_v60 = vadd.f32 %v791_v29, %v657_v59  ;;  %v796_v61 = vpop.f32.mrf.mxu3 }
  0xd0   : > { %951 = vst.msk [vmem:[%s1581_s25 + $0x10] sm:$0xf] %vm946_vm0, %v900_v58  ;;  %v599_v62 = vpop.f32.mrf.mxu0 }
  0xd1   : > { %v874_v63 = vmax.f32 %v792_v60, 0.0  ;;  %v733_v0 = vpop.f32.mrf.mxu1 }
  0xd2   : > { %v734_v2 = vadd.f32 %v733_v0, %v599_v62 }
  0xd3   : > { %v924_v4 = vpack.c.bf16 %v874_v63, %v874_v63 }
  0xd4   : > { %v851_v8 = vmax.f32 %v734_v2, 0.0 }
  0xd5   : > { %975 = vst.msk [vmem:[%s1581_s25 + $0x70] sm:$0xf] %vm946_vm0, %v924_v4 }
  0xd6   : > { %v901_v13 = vpack.c.bf16 %v851_v8, %v851_v8  ;;  %v659_v14 = vpop.f32.mrf.mxu2 }
  0xd7   : > { %v794_v15 = vadd.f32 %v793_v49, %v659_v14  ;;  %v798_v19 = vpop.f32.mrf.mxu3 }
  0xd8   : > { %952 = vst.msk [vmem:[%s1581_s25 + $0x14] sm:$0xf] %vm946_vm0, %v901_v13  ;;  %v602_v20 = vpop.f32.mrf.mxu0 }
  0xd9   : > { %v875_v23 = vmax.f32 %v794_v15, 0.0  ;;  %v736_v24 = vpop.f32.mrf.mxu1 }
  0xda   : > { %v737_v25 = vadd.f32 %v736_v24, %v602_v20 }
  0xdb   : > { %v925_v26 = vpack.c.bf16 %v875_v23, %v875_v23  ;;  %641 = vmatmul.bf16.gmra.mxu0 %v1152_v17  ;;  %701 = vmatmul.bf16.gmra.mxu2 %v1248_v18 }
  0xdc   : > { %v852_v27 = vmax.f32 %v737_v25, 0.0  ;;  %775 = vmatmul.bf16.gmra.mxu1 %v1156_v21  ;;  %840 = vmatmul.bf16.gmra.mxu3 %v1260_v22 }
  0xdd   : > { %976 = vst.msk [vmem:[%s1581_s25 + $0x74] sm:$0xf] %vm946_vm0, %v925_v26 }
  0xde   : > { %v902_v28 = vpack.c.bf16 %v852_v27, %v852_v27  ;;  %v662_v29 = vpop.f32.mrf.mxu2 }
  0xdf   : > { %v797_v30 = vadd.f32 %v796_v61, %v662_v29  ;;  %v801_v31 = vpop.f32.mrf.mxu3 }
  0xe0   : > { %953 = vst.msk [vmem:[%s1581_s25 + $0x18] sm:$0xf] %vm946_vm0, %v902_v28  ;;  %v604_v32 = vpop.f32.mrf.mxu0 }
  0xe1   : > { %v876_v33 = vmax.f32 %v797_v30, 0.0  ;;  %v738_v34 = vpop.f32.mrf.mxu1 }
  0xe2   : > { %v739_v35 = vadd.f32 %v738_v34, %v604_v32 }
  0xe3   : > { %v926_v36 = vpack.c.bf16 %v876_v33, %v876_v33 }
  0xe4   : > { %v853_v37 = vmax.f32 %v739_v35, 0.0 }
  0xe5   : > { %977 = vst.msk [vmem:[%s1581_s25 + $0x78] sm:$0xf] %vm946_vm0, %v926_v36 }
  0xe6   : > { %v903_v42 = vpack.c.bf16 %v853_v37, %v853_v37  ;;  %v664_v43 = vpop.f32.mrf.mxu2 }
  0xe7   : > { %v799_v44 = vadd.f32 %v798_v19, %v664_v43  ;;  %v803_v46 = vpop.f32.mrf.mxu3 }
  0xe8   : > { %954 = vst.msk [vmem:[%s1581_s25 + $0x1c] sm:$0xf] %vm946_vm0, %v903_v42  ;;  %v607_v47 = vpop.f32.mrf.mxu0 }
  0xe9   : > { %v877_v49 = vmax.f32 %v799_v44, 0.0  ;;  %v741_v50 = vpop.f32.mrf.mxu1 }
  0xea   : > { %v742_v51 = vadd.f32 %v741_v50, %v607_v47 }
  0xeb   : > { %v927_v52 = vpack.c.bf16 %v877_v49, %v877_v49  ;;  %706 = vmatmul.bf16.gmra.mxu2 %v1256_v45 }
  0xec   : > { %v854_v53 = vmax.f32 %v742_v51, 0.0  ;;  %780 = vmatmul.bf16.gmra.mxu1 %v1164_v48 }
  0xed   : > { %978 = vst.msk [vmem:[%s1581_s25 + $0x7c] sm:$0xf] %vm946_vm0, %v927_v52 }
  0xee   : > { %v904_v54 = vpack.c.bf16 %v854_v53, %v854_v53  ;;  %v667_v55 = vpop.f32.mrf.mxu2 }
  0xef   : > { %v802_v56 = vadd.f32 %v801_v31, %v667_v55  ;;  %v806_v57 = vpop.f32.mrf.mxu3 }
  0xf0   : > { %955 = vst.msk [vmem:[%s1581_s25 + $0x20] sm:$0xf] %vm946_vm0, %v904_v54  ;;  %v609_v58 = vpop.f32.mrf.mxu0 }
  0xf1   : > { %v878_v59 = vmax.f32 %v802_v56, 0.0  ;;  %v743_v60 = vpop.f32.mrf.mxu1 }
  0xf2   : > { %v744_v61 = vadd.f32 %v743_v60, %v609_v58 }
  0xf3   : > { %v928_v62 = vpack.c.bf16 %v878_v59, %v878_v59 }
  0xf4   : > { %v855_v63 = vmax.f32 %v744_v61, 0.0 }
  0xf5   : > { %979 = vst.msk [vmem:[%s1581_s25 + $0x80] sm:$0xf] %vm946_vm0, %v928_v62 }
  0xf6   : > { %v905_v0 = vpack.c.bf16 %v855_v63, %v855_v63  ;;  %v669_v2 = vpop.f32.mrf.mxu2 }
  0xf7   : > { %v804_v3 = vadd.f32 %v803_v46, %v669_v2  ;;  %v808_v4 = vpop.f32.mrf.mxu3 }
  0xf8   : > { %956 = vst.msk [vmem:[%s1581_s25 + $0x24] sm:$0xf] %vm946_vm0, %v905_v0  ;;  %v612_v5 = vpop.f32.mrf.mxu0 }
  0xf9   : > { %v879_v6 = vmax.f32 %v804_v3, 0.0  ;;  %v746_v7 = vpop.f32.mrf.mxu1 }
  0xfa   : > { %v747_v8 = vadd.f32 %v746_v7, %v612_v5 }
  0xfb   : > { %v929_v9 = vpack.c.bf16 %v879_v6, %v879_v6 }
  0xfc   : > { %v856_v10 = vmax.f32 %v747_v8, 0.0 }
  0xfd   : > { %980 = vst.msk [vmem:[%s1581_s25 + $0x84] sm:$0xf] %vm946_vm0, %v929_v9 }
  0xfe   : > { %v906_v11 = vpack.c.bf16 %v856_v10, %v856_v10  ;;  %v672_v12 = vpop.f32.mrf.mxu2 }
  0xff   : > { %v807_v13 = vadd.f32 %v806_v57, %v672_v12  ;;  %v811_v14 = vpop.f32.mrf.mxu3 }
 0x100   : > { %957 = vst.msk [vmem:[%s1581_s25 + $0x28] sm:$0xf] %vm946_vm0, %v906_v11  ;;  %v614_v15 = vpop.f32.mrf.mxu0 }
 0x101   : > { %v880_v17 = vmax.f32 %v807_v13, 0.0  ;;  %v748_v18 = vpop.f32.mrf.mxu1 }
 0x102   : > { %v749_v19 = vadd.f32 %v748_v18, %v614_v15 }
 0x103   : > { %v930_v20 = vpack.c.bf16 %v880_v17, %v880_v17 }
 0x104   : > { %v857_v21 = vmax.f32 %v749_v19, 0.0 }
 0x105   : > { %981 = vst.msk [vmem:[%s1581_s25 + $0x88] sm:$0xf] %vm946_vm0, %v930_v20 }
 0x106   : > { %v907_v22 = vpack.c.bf16 %v857_v21, %v857_v21  ;;  %v674_v23 = vpop.f32.mrf.mxu2 }
 0x107   : > { %v809_v24 = vadd.f32 %v808_v4, %v674_v23  ;;  %v813_v25 = vpop.f32.mrf.mxu3 }
 0x108   : > { %958 = vst.msk [vmem:[%s1581_s25 + $0x2c] sm:$0xf] %vm946_vm0, %v907_v22  ;;  %v617_v26 = vpop.f32.mrf.mxu0 }
 0x109   : > { %v881_v27 = vmax.f32 %v809_v24, 0.0  ;;  %v751_v28 = vpop.f32.mrf.mxu1 }
 0x10a   : > { %v752_v29 = vadd.f32 %v751_v28, %v617_v26 }
 0x10b   : > { %v931_v30 = vpack.c.bf16 %v881_v27, %v881_v27 }
 0x10c   : > { %v858_v31 = vmax.f32 %v752_v29, 0.0 }
 0x10d   : > { %982 = vst.msk [vmem:[%s1581_s25 + $0x8c] sm:$0xf] %vm946_vm0, %v931_v30 }
 0x10e   : > { %v908_v32 = vpack.c.bf16 %v858_v31, %v858_v31  ;;  %v677_v33 = vpop.f32.mrf.mxu2 }
 0x10f   : > { %v812_v34 = vadd.f32 %v811_v14, %v677_v33  ;;  %v816_v35 = vpop.f32.mrf.mxu3 }
 0x110   : > { %959 = vst.msk [vmem:[%s1581_s25 + $0x30] sm:$0xf] %vm946_vm0, %v908_v32  ;;  %v619_v36 = vpop.f32.mrf.mxu0 }
 0x111   : > { %v882_v37 = vmax.f32 %v812_v34, 0.0  ;;  %v753_v38 = vpop.f32.mrf.mxu1 }
 0x112   : > { %v754_v39 = vadd.f32 %v753_v38, %v619_v36 }
 0x113   : > { %v932_v40 = vpack.c.bf16 %v882_v37, %v882_v37 }
 0x114   : > { %v859_v41 = vmax.f32 %v754_v39, 0.0 }
 0x115   : > { %983 = vst.msk [vmem:[%s1581_s25 + $0x90] sm:$0xf] %vm946_vm0, %v932_v40 }
 0x116   : > { %v909_v42 = vpack.c.bf16 %v859_v41, %v859_v41  ;;  %v679_v43 = vpop.f32.mrf.mxu2 }
 0x117   : > { %v814_v44 = vadd.f32 %v813_v25, %v679_v43  ;;  %v818_v45 = vpop.f32.mrf.mxu3 }
 0x118   : > { %960 = vst.msk [vmem:[%s1581_s25 + $0x34] sm:$0xf] %vm946_vm0, %v909_v42  ;;  %v622_v46 = vpop.f32.mrf.mxu0 }
 0x119   : > { %v883_v47 = vmax.f32 %v814_v44, 0.0  ;;  %v756_v48 = vpop.f32.mrf.mxu1 }
 0x11a   : > { %v757_v49 = vadd.f32 %v756_v48, %v622_v46 }
 0x11b   : > { %v933_v50 = vpack.c.bf16 %v883_v47, %v883_v47 }
 0x11c   : > { %v860_v51 = vmax.f32 %v757_v49, 0.0 }
 0x11d   : > { %984 = vst.msk [vmem:[%s1581_s25 + $0x94] sm:$0xf] %vm946_vm0, %v933_v50 }
 0x11e   : > { %v910_v52 = vpack.c.bf16 %v860_v51, %v860_v51  ;;  %v682_v53 = vpop.f32.mrf.mxu2 }
 0x11f   : > { %v817_v54 = vadd.f32 %v816_v35, %v682_v53  ;;  %v821_v55 = vpop.f32.mrf.mxu3 }
 0x120   : > { %961 = vst.msk [vmem:[%s1581_s25 + $0x38] sm:$0xf] %vm946_vm0, %v910_v52  ;;  %v624_v56 = vpop.f32.mrf.mxu0 }
 0x121   : > { %v884_v57 = vmax.f32 %v817_v54, 0.0  ;;  %v758_v58 = vpop.f32.mrf.mxu1 }
 0x122   : > { %v759_v59 = vadd.f32 %v758_v58, %v624_v56 }
 0x123   : > { %v934_v60 = vpack.c.bf16 %v884_v57, %v884_v57 }
 0x124   : > { %v861_v61 = vmax.f32 %v759_v59, 0.0 }
 0x125   : > { %985 = vst.msk [vmem:[%s1581_s25 + $0x98] sm:$0xf] %vm946_vm0, %v934_v60 }
 0x126   : > { %v911_v62 = vpack.c.bf16 %v861_v61, %v861_v61  ;;  %v684_v63 = vpop.f32.mrf.mxu2 }
 0x127   : > { %v819_v0 = vadd.f32 %v818_v45, %v684_v63  ;;  %v823_v2 = vpop.f32.mrf.mxu3 }
 0x128   : > { %962 = vst.msk [vmem:[%s1581_s25 + $0x3c] sm:$0xf] %vm946_vm0, %v911_v62  ;;  %v627_v3 = vpop.f32.mrf.mxu0 }
 0x129   : > { %v885_v4 = vmax.f32 %v819_v0, 0.0  ;;  %v761_v5 = vpop.f32.mrf.mxu1 }
 0x12a   : > { %v762_v6 = vadd.f32 %v761_v5, %v627_v3 }
 0x12b   : > { %v935_v7 = vpack.c.bf16 %v885_v4, %v885_v4 }
 0x12c   : > { %v862_v8 = vmax.f32 %v762_v6, 0.0 }
 0x12d   : > { %986 = vst.msk [vmem:[%s1581_s25 + $0x9c] sm:$0xf] %vm946_vm0, %v935_v7 }
 0x12e   : > { %v912_v9 = vpack.c.bf16 %v862_v8, %v862_v8  ;;  %v687_v10 = vpop.f32.mrf.mxu2 }
 0x12f   : > { %v822_v11 = vadd.f32 %v821_v55, %v687_v10  ;;  %v826_v13 = vpop.f32.mrf.mxu3 }
 0x130   : > { %963 = vst.msk [vmem:[%s1581_s25 + $0x40] sm:$0xf] %vm946_vm0, %v912_v9  ;;  %v629_v12 = vpop.f32.mrf.mxu0 }
 0x131   : > { %v886_v14 = vmax.f32 %v822_v11, 0.0  ;;  %v763_v15 = vpop.f32.mrf.mxu1 }
 0x132   : > { %v764_v17 = vadd.f32 %v763_v15, %v629_v12 }
 0x133   : > { %v936_v18 = vpack.c.bf16 %v886_v14, %v886_v14 }
 0x134   : > { %v863_v19 = vmax.f32 %v764_v17, 0.0 }
 0x135   : > { %987 = vst.msk [vmem:[%s1581_s25 + $0xa0] sm:$0xf] %vm946_vm0, %v936_v18 }
 0x136   : > { %v913_v20 = vpack.c.bf16 %v863_v19, %v863_v19  ;;  %v689_v21 = vpop.f32.mrf.mxu2 }
 0x137   : > { %v824_v22 = vadd.f32 %v823_v2, %v689_v21  ;;  %v828_v27 = vpop.f32.mrf.mxu3 }
 0x138   : > { %964 = vst.msk [vmem:[%s1581_s25 + $0x44] sm:$0xf] %vm946_vm0, %v913_v20  ;;  %v632_v23 = vpop.f32.mrf.mxu0 }
 0x139   : > { %v887_v24 = vmax.f32 %v824_v22, 0.0  ;;  %v766_v25 = vpop.f32.mrf.mxu1 }
 0x13a   : > { %v767_v26 = vadd.f32 %v766_v25, %v632_v23 }
 0x13b   : > { %v937_v28 = vpack.c.bf16 %v887_v24, %v887_v24 }
 0x13c   : > { %v864_v29 = vmax.f32 %v767_v26, 0.0 }
 0x13d   : > { %988 = vst.msk [vmem:[%s1581_s25 + $0xa4] sm:$0xf] %vm946_vm0, %v937_v28 }
 0x13e   : > { %v914_v30 = vpack.c.bf16 %v864_v29, %v864_v29  ;;  %v692_v31 = vpop.f32.mrf.mxu2 }
 0x13f   : > { %v827_v32 = vadd.f32 %v826_v13, %v692_v31  ;;  %v831_v39 = vpop.f32.mrf.mxu3 }
 0x140   : > { %965 = vst.msk [vmem:[%s1581_s25 + $0x48] sm:$0xf] %vm946_vm0, %v914_v30  ;;  %v634_v33 = vpop.f32.mrf.mxu0 }
 0x141   : > { %v888_v34 = vmax.f32 %v827_v32, 0.0  ;;  %v768_v35 = vpop.f32.mrf.mxu1 }
 0x142   : > { %v769_v36 = vadd.f32 %v768_v35, %v634_v33 }
 0x143   : > { %v938_v37 = vpack.c.bf16 %v888_v34, %v888_v34 }
 0x144   : > { %v865_v38 = vmax.f32 %v769_v36, 0.0 }
 0x145   : > { %989 = vst.msk [vmem:[%s1581_s25 + $0xa8] sm:$0xf] %vm946_vm0, %v938_v37 }
 0x146   : > { %v915_v40 = vpack.c.bf16 %v865_v38, %v865_v38  ;;  %v694_v41 = vpop.f32.mrf.mxu2 }
 0x147   : > { %v829_v42 = vadd.f32 %v828_v27, %v694_v41  ;;  %v833_v51 = vpop.f32.mrf.mxu3 }
 0x148   : > { %966 = vst.msk [vmem:[%s1581_s25 + $0x4c] sm:$0xf] %vm946_vm0, %v915_v40  ;;  %v637_v43 = vpop.f32.mrf.mxu0 }
 0x149   : > { %v889_v44 = vmax.f32 %v829_v42, 0.0  ;;  %v771_v45 = vpop.f32.mrf.mxu1 }
 0x14a   : > { %v772_v46 = vadd.f32 %v771_v45, %v637_v43 }
 0x14b   : > { %v939_v47 = vpack.c.bf16 %v889_v44, %v889_v44 }
 0x14c   : > { %v866_v48 = vmax.f32 %v772_v46, 0.0 }
 0x14d   : > { %990 = vst.msk [vmem:[%s1581_s25 + $0xac] sm:$0xf] %vm946_vm0, %v939_v47 }
 0x14e   : > { %v916_v49 = vpack.c.bf16 %v866_v48, %v866_v48  ;;  %v697_v50 = vpop.f32.mrf.mxu2 }
 0x14f   : > { %v832_v52 = vadd.f32 %v831_v39, %v697_v50  ;;  %v836_v62 = vpop.f32.mrf.mxu3 }
 0x150   : > { %967 = vst.msk [vmem:[%s1581_s25 + $0x50] sm:$0xf] %vm946_vm0, %v916_v49  ;;  %v639_v53 = vpop.f32.mrf.mxu0 }
 0x151   : > { %v890_v54 = vmax.f32 %v832_v52, 0.0  ;;  %v773_v55 = vpop.f32.mrf.mxu1 }
 0x152   : > { %v774_v56 = vadd.f32 %v773_v55, %v639_v53 }
 0x153   : > { %v940_v57 = vpack.c.bf16 %v890_v54, %v890_v54 }
 0x154   : > { %v867_v58 = vmax.f32 %v774_v56, 0.0 }
 0x155   : > { %991 = vst.msk [vmem:[%s1581_s25 + $0xb0] sm:$0xf] %vm946_vm0, %v940_v57 }
 0x156   : > { %v917_v59 = vpack.c.bf16 %v867_v58, %v867_v58  ;;  %v699_v60 = vpop.f32.mrf.mxu2 }
 0x157   : > { %v834_v61 = vadd.f32 %v833_v51, %v699_v60  ;;  %v838_v12 = vpop.f32.mrf.mxu3 }
 0x158   : > { %968 = vst.msk [vmem:[%s1581_s25 + $0x54] sm:$0xf] %vm946_vm0, %v917_v59  ;;  %v642_v63 = vpop.f32.mrf.mxu0 }
 0x159   : > { %v891_v0 = vmax.f32 %v834_v61, 0.0  ;;  %v776_v2 = vpop.f32.mrf.mxu1 }
 0x15a   : > { %v777_v3 = vadd.f32 %v776_v2, %v642_v63 }
 0x15b   : > { %v941_v4 = vpack.c.bf16 %v891_v0, %v891_v0 }
 0x15c   : > { %v868_v5 = vmax.f32 %v777_v3, 0.0 }
 0x15d   : > { %992 = vst.msk [vmem:[%s1581_s25 + $0xb4] sm:$0xf] %vm946_vm0, %v941_v4 }
 0x15e   : > { %v918_v6 = vpack.c.bf16 %v868_v5, %v868_v5  ;;  %v702_v7 = vpop.f32.mrf.mxu2 }
 0x15f   : > { %v837_v8 = vadd.f32 %v836_v62, %v702_v7  ;;  %v841_v24 = vpop.f32.mrf.mxu3 }
 0x160   : > { %969 = vst.msk [vmem:[%s1581_s25 + $0x58] sm:$0xf] %vm946_vm0, %v918_v6  ;;  %v644_v9 = vpop.f32.mrf.mxu0 }
 0x161   : > { %v892_v10 = vmax.f32 %v837_v8, 0.0  ;;  %v778_v11 = vpop.f32.mrf.mxu1 }
 0x162   : > { %v779_v13 = vadd.f32 %v778_v11, %v644_v9 }
 0x163   : > { %v942_v14 = vpack.c.bf16 %v892_v10, %v892_v10 }
 0x164   : > { %v869_v15 = vmax.f32 %v779_v13, 0.0 }
 0x165   : > { %993 = vst.msk [vmem:[%s1581_s25 + $0xb8] sm:$0xf] %vm946_vm0, %v942_v14 }
 0x166   : > { %v919_v17 = vpack.c.bf16 %v869_v15, %v869_v15  ;;  %v704_v18 = vpop.f32.mrf.mxu2 }
 0x167   : > { %v839_v19 = vadd.f32 %v838_v12, %v704_v18 }
 0x168   : > { %970 = vst.msk [vmem:[%s1581_s25 + $0x5c] sm:$0xf] %vm946_vm0, %v919_v17 }
 0x169   : > { %v893_v20 = vmax.f32 %v839_v19, 0.0  ;;  %v781_v21 = vpop.f32.mrf.mxu1 }
 0x16a   : > { %v782_v22 = vadd.f32 %v781_v21, %v1583_v1  ;;  %v843_v1 = vpop.f32.mrf.mxu3 }
 0x16b   : > { %v943_v23 = vpack.c.bf16 %v893_v20, %v893_v20 }
 0x16c   : > { %v870_v25 = vmax.f32 %v782_v22, 0.0 }
 0x16d   : > { %994 = vst.msk [vmem:[%s1581_s25 + $0xbc] sm:$0xf] %vm946_vm0, %v943_v23 }
 0x16e   : > { %v920_v26 = vpack.c.bf16 %v870_v25, %v870_v25  ;;  %v707_v27 = vpop.f32.mrf.mxu2 }
 0x16f   : > { %v842_v28 = vadd.f32 %v841_v24, %v707_v27 }
 0x170   : > { %971 = vst.msk [vmem:[%s1581_s25 + $0x60] sm:$0xf] %vm946_vm0, %v920_v26 }
 0x171   : > { %v894_v29 = vmax.f32 %v842_v28, 0.0  ;;  %v783_v30 = vpop.f32.mrf.mxu1 }
 0x172   : > { %v784_v31 = vadd.f32 %v783_v30, %v1595_v16 }
 0x173   : > { %v944_v32 = vpack.c.bf16 %v894_v29, %v894_v29 }
 0x174   : > { %v871_v33 = vmax.f32 %v784_v31, 0.0 }
 0x175   : > { %995 = vst.msk [vmem:[%s1581_s25 + $0xc0] sm:$0xf] %vm946_vm0, %v944_v32 }
 0x176   : > { %v921_v34 = vpack.c.bf16 %v871_v33, %v871_v33  ;;  %v709_v35 = vpop.f32.mrf.mxu2 }
 0x177   : > { %v844_v36 = vadd.f32 %v843_v1, %v709_v35 }
 0x178   : > { %972 = vst.msk [vmem:[%s1581_s25 + $0x64] sm:$0xf] %vm946_vm0, %v921_v34 }
 0x179   : > { %v895_v37 = vmax.f32 %v844_v36, 0.0 }
 0x17b   : > { %v945_v38 = vpack.c.bf16 %v895_v37, %v895_v37 }
 0x17d   : > { %996 = vst.msk [vmem:[%s1581_s25 + $0xc4] sm:$0xf] %vm946_vm0, %v945_v38 }
 0x17e PF: > { %s12_s9 = sadd.s32 1, %s1424_s9  }
 0x17f   : > { %p9_p4 = scmp.ge.s32.totalorder %s12_s9, 4  }
 0x181   :  { %11 = sbr.rel (!%p9_p4) target bundleno = 1 (0x1), region = 58 }

// kernel: dqn_forward.5
= control target key start
LH: loop header
LB: loop body
LE: loop exit
PB: predicated region body
PF: predicated region fallthrough
CT: control target
= control target key end

     0   :  { %s1121_s9 = smov 0   ;;  %s1314_s0 = inlined_call_operand.vmem [shape: bf16[192,512], index: 0, kind: input, shape index: {}]   ;;  %s1315_s1 = inlined_call_operand.vmem [shape: bf16[512,64], index: 1, kind: input, shape index: {}]   ;;  %s1316_s2 = inlined_call_operand.vmem [shape: bf16[192,64], index: 2, kind: output, shape index: {}]  }
   0x1 LB: > { %s799_s10 = sadd.s32 4294967295, %s1104_s9   ;;  %p803_p0 = scmp.ge.s32.totalorder %s1104_s9, 1  ;;  %s1104_s9 = sphi %s1121_s9, %s12_s9  }
   0x2   : > { %p114_p1 = scmp.lt.s32.totalorder %s1104_s9, 3 }
   0x4   : > { %p115_p2 = pnand %p803_p0, %p114_p1 }
   0x5   : > { %s137_s7 = smul.u32 (!%p115_p2), 12, %s799_s10 }
   0x6   : > { %118 = sbr.rel (%p115_p2) target bundleno = 274 (0x112), region = 28 }
   0x7   : > { %p138_p3 = scmp.lt.s32.totalorder (!%p115_p2), %s137_s7, 23 }
   0xb   : > { %v1065_v0 = vld [vmem:[%s1315_s1 + $0x38] sm:$0xff]  ;;  %v1064_v4 = vld [vmem:[%s1315_s1 + $0x30] sm:$0xff]  ;;  %v1063_v8 = vld [vmem:[%s1315_s1 + $0x28] sm:$0xff]  ;;  %s1318_s7 = smov (!%p138_p3, %s137_s7), 23  ;;  %vm730_vm0 = vcmask 519168  }
   0xc   : > { %v1073_v1 = vld [vmem:[%s1315_s1 + $0x78] sm:$0xff]  ;;  %550 = vmatpush.bf16.msra.mxu0 %v1065_v0  ;;  %v1072_v5 = vld [vmem:[%s1315_s1 + $0x70] sm:$0xff]  ;;  %v1071_v9 = vld [vmem:[%s1315_s1 + $0x68] sm:$0xff]  ;;  %s1033_s5 = sshll.u32 %s1318_s7, 4  ;;  %s806_s27 = sshll.u32 %s1318_s7, 2 }
   0xd   : > { %v1081_v2 = vld [vmem:[%s1315_s1 + $0xb8] sm:$0xff]  ;;  %589 = vmatpush.bf16.msra.mxu1 %v1073_v1  ;;  %v1080_v6 = vld [vmem:[%s1315_s1 + $0xb0] sm:$0xff]  ;;  %v1079_v10 = vld [vmem:[%s1315_s1 + $0xa8] sm:$0xff]  ;;  %s1213_s15 = scalar_lea.vmem %s1314_s0, %s1033_s5  ;;  %s1285_s30 = scalar_lea.vmem %s1316_s2, %s806_s27 }
   0xe   : > { %v1089_v3 = vld [vmem:[%s1315_s1 + $0xf8] sm:$0xff]  ;;  %628 = vmatpush.bf16.msra.mxu2 %v1081_v2  ;;  %v1088_v7 = vld [vmem:[%s1315_s1 + $0xf0] sm:$0xff]  ;;  %v1087_v11 = vld [vmem:[%s1315_s1 + $0xe8] sm:$0xff] }
   0xf   : > { %667 = vmatpush.bf16.msra.mxu3 %v1089_v3  ;;  %v1062_v12 = vld [vmem:[%s1315_s1 + $0x20] sm:$0xff]  ;;  %v1061_v16 = vld [vmem:[%s1315_s1 + $0x18] sm:$0xff]  ;;  %v1060_v20 = vld [vmem:[%s1315_s1 + $0x10] sm:$0xff] }
  0x10   : > { %551 = vmatpush.bf16.msra.mxu0 %v1064_v4  ;;  %v1070_v13 = vld [vmem:[%s1315_s1 + $0x60] sm:$0xff]  ;;  %v1069_v17 = vld [vmem:[%s1315_s1 + $0x58] sm:$0xff]  ;;  %v1068_v21 = vld [vmem:[%s1315_s1 + $0x50] sm:$0xff] }
  0x11   : > { %590 = vmatpush.bf16.msra.mxu1 %v1072_v5  ;;  %v1078_v14 = vld [vmem:[%s1315_s1 + $0xa0] sm:$0xff]  ;;  %v1077_v18 = vld [vmem:[%s1315_s1 + $0x98] sm:$0xff]  ;;  %v1076_v22 = vld [vmem:[%s1315_s1 + $0x90] sm:$0xff] }
  0x12   : > { %629 = vmatpush.bf16.msra.mxu2 %v1080_v6  ;;  %v1086_v15 = vld [vmem:[%s1315_s1 + $0xe0] sm:$0xff]  ;;  %v1085_v19 = vld [vmem:[%s1315_s1 + $0xd8] sm:$0xff]  ;;  %v1084_v23 = vld [vmem:[%s1315_s1 + $0xd0] sm:$0xff] }
  0x13   : > { %668 = vmatpush.bf16.msra.mxu3 %v1088_v7  ;;  %v1059_v24 = vld [vmem:[%s1315_s1 + $0x8] sm:$0xff]  ;;  %v1058_v28 = vld [vmem:[%s1315_s1] sm:$0xff]  ;;  %v1036_v33 = vld [vmem:[%s1213_s15 + $0xc] sm:$0xf0] }
  0x14   : > { %552 = vmatpush.bf16.msra.mxu0 %v1063_v8  ;;  %v1067_v25 = vld [vmem:[%s1315_s1 + $0x48] sm:$0xff]  ;;  %v1066_v29 = vld [vmem:[%s1315_s1 + $0x40] sm:$0xff]  ;;  %v811_v35 = vld [vmem:[%s1213_s15 + $0x10] sm:$0xf0] }
  0x15   : > { %591 = vmatpush.bf16.msra.mxu1 %v1071_v9  ;;  %v1075_v26 = vld [vmem:[%s1315_s1 + $0x88] sm:$0xff]  ;;  %v1074_v30 = vld [vmem:[%s1315_s1 + $0x80] sm:$0xff]  ;;  %v1037_v37 = vld [vmem:[%s1213_s15 + $0x14] sm:$0xf0] }
  0x16   : > { %630 = vmatpush.bf16.msra.mxu2 %v1079_v10  ;;  %v1083_v27 = vld [vmem:[%s1315_s1 + $0xc8] sm:$0xff]  ;;  %v1082_v31 = vld [vmem:[%s1315_s1 + $0xc0] sm:$0xff]  ;;  %v819_v39 = vld [vmem:[%s1213_s15 + $0x18] sm:$0xf0] }
  0x17   : > { %669 = vmatpush.bf16.msra.mxu3 %v1087_v11  ;;  %v809_v32 = vld [vmem:[%s1213_s15] sm:$0xf]  ;;  %v1034_v34 = vld [vmem:[%s1213_s15 + $0x4] sm:$0xf]  ;;  %v817_v36 = vld [vmem:[%s1213_s15 + $0x8] sm:$0xf] }
  0x18   : > { %553 = vmatpush.bf16.msra.mxu0 %v1062_v12  ;;  %v1035_v38 = vld [vmem:[%s1213_s15 + $0xc] sm:$0xf]  ;;  %v810_v40 = vor.u32 %v1036_v33, %v809_v32  ;;  %v814_v41 = vor.u32 %v1034_v34, %v811_v35  ;;  %v818_v42 = vor.u32 %v1037_v37, %v817_v36  ;;  %v825_v44 = vld [vmem:[%s1213_s15 + $0x20] sm:$0xf]  ;;  %v1040_v45 = vld [vmem:[%s1213_s15 + $0x2c] sm:$0xf0] }
  0x19   : > { %592 = vmatpush.bf16.msra.mxu1 %v1070_v13  ;;  %v822_v43 = vor.u32 %v1035_v38, %v819_v39  ;;  %v1038_v46 = vld [vmem:[%s1213_s15 + $0x24] sm:$0xf]  ;;  %v827_v47 = vld [vmem:[%s1213_s15 + $0x30] sm:$0xf0]  ;;  %v833_v48 = vld [vmem:[%s1213_s15 + $0x28] sm:$0xf]  ;;  %v826_v52 = vor.u32 %v1040_v45, %v825_v44 }
  0x1a   : > { %631 = vmatpush.bf16.msra.mxu2 %v1078_v14  ;;  %v1041_v49 = vld [vmem:[%s1213_s15 + $0x34] sm:$0xf0]  ;;  %v1039_v50 = vld [vmem:[%s1213_s15 + $0x2c] sm:$0xf]  ;;  %v835_v51 = vld [vmem:[%s1213_s15 + $0x38] sm:$0xf0]  ;;  %v830_v53 = vor.u32 %v1038_v46, %v827_v47 }
  0x1b   : > { %670 = vmatpush.bf16.msra.mxu3 %v1086_v15  ;;  %v834_v54 = vor.u32 %v1041_v49, %v833_v48  ;;  %v838_v55 = vor.u32 %v1039_v50, %v835_v51  ;;  %v841_v56 = vld [vmem:[%s1213_s15 + $0x40] sm:$0xf]  ;;  %v1044_v57 = vld [vmem:[%s1213_s15 + $0x4c] sm:$0xf0]  ;;  %v1042_v58 = vld [vmem:[%s1213_s15 + $0x44] sm:$0xf] }
  0x1c   : > { %554 = vmatpush.bf16.msra.mxu0 %v1061_v16  ;;  %v843_v59 = vld [vmem:[%s1213_s15 + $0x50] sm:$0xf0]  ;;  %v849_v60 = vld [vmem:[%s1213_s15 + $0x48] sm:$0xf]  ;;  %v1045_v61 = vld [vmem:[%s1213_s15 + $0x54] sm:$0xf0]  ;;  %v842_v0 = vor.u32 %v1044_v57, %v841_v56 }
  0x1d   : > { %593 = vmatpush.bf16.msra.mxu1 %v1069_v17  ;;  %v1043_v62 = vld [vmem:[%s1213_s15 + $0x4c] sm:$0xf]  ;;  %v851_v63 = vld [vmem:[%s1213_s15 + $0x58] sm:$0xf0]  ;;  %v846_v1 = vor.u32 %v1042_v58, %v843_v59  ;;  %v850_v2 = vor.u32 %v1045_v61, %v849_v60  ;;  %v857_v4 = vld [vmem:[%s1213_s15 + $0x60] sm:$0xf] }
  0x1e   : > { %632 = vmatpush.bf16.msra.mxu2 %v1077_v18  ;;  %v854_v3 = vor.u32 %v1043_v62, %v851_v63  ;;  %v1048_v5 = vld [vmem:[%s1213_s15 + $0x6c] sm:$0xf0]  ;;  %v1046_v6 = vld [vmem:[%s1213_s15 + $0x64] sm:$0xf]  ;;  %v859_v7 = vld [vmem:[%s1213_s15 + $0x70] sm:$0xf0] }
  0x1f   : > { %671 = vmatpush.bf16.msra.mxu3 %v1085_v19  ;;  %v865_v8 = vld [vmem:[%s1213_s15 + $0x68] sm:$0xf]  ;;  %v1049_v9 = vld [vmem:[%s1213_s15 + $0x74] sm:$0xf0]  ;;  %v1047_v10 = vld [vmem:[%s1213_s15 + $0x6c] sm:$0xf]  ;;  %v858_v12 = vor.u32 %v1048_v5, %v857_v4  ;;  %v862_v13 = vor.u32 %v1046_v6, %v859_v7 }
  0x20   : > { %555 = vmatpush.bf16.msra.mxu0 %v1060_v20  ;;  %v867_v11 = vld [vmem:[%s1213_s15 + $0x78] sm:$0xf0]  ;;  %v866_v14 = vor.u32 %v1049_v9, %v865_v8  ;;  %v873_v16 = vld [vmem:[%s1213_s15 + $0x80] sm:$0xf]  ;;  %v1052_v17 = vld [vmem:[%s1213_s15 + $0x8c] sm:$0xf0] }
  0x21   : > { %594 = vmatpush.bf16.msra.mxu1 %v1068_v21  ;;  %v870_v15 = vor.u32 %v1047_v10, %v867_v11  ;;  %v1050_v18 = vld [vmem:[%s1213_s15 + $0x84] sm:$0xf]  ;;  %v875_v19 = vld [vmem:[%s1213_s15 + $0x90] sm:$0xf0]  ;;  %v881_v20 = vld [vmem:[%s1213_s15 + $0x88] sm:$0xf] }
  0x22   : > { %633 = vmatpush.bf16.msra.mxu2 %v1076_v22  ;;  %v1053_v21 = vld [vmem:[%s1213_s15 + $0x94] sm:$0xf0]  ;;  %v1051_v22 = vld [vmem:[%s1213_s15 + $0x8c] sm:$0xf]  ;;  %v897_v32 = vld [vmem:[%s1213_s15 + $0xa8] sm:$0xf] }
  0x23   : > { %672 = vmatpush.bf16.msra.mxu3 %v1084_v23  ;;  %v883_v23 = vld [vmem:[%s1213_s15 + $0x98] sm:$0xf0]  ;;  %v1057_v33 = vld [vmem:[%s1213_s15 + $0xb4] sm:$0xf0]  ;;  %v1055_v34 = vld [vmem:[%s1213_s15 + $0xac] sm:$0xf] }
  0x24   : > { %556 = vmatpush.bf16.msra.mxu0 %v1059_v24  ;;  %v874_v24 = vor.u32 %v1052_v17, %v873_v16  ;;  %v899_v35 = vld [vmem:[%s1213_s15 + $0xb8] sm:$0xf0]  ;;  %v898_v38 = vor.u32 %v1057_v33, %v897_v32 }
  0x25   : > { %595 = vmatpush.bf16.msra.mxu1 %v1067_v25  ;;  %v878_v25 = vor.u32 %v1050_v18, %v875_v19  ;;  %v902_v39 = vor.u32 %v1055_v34, %v899_v35 }
  0x26   : > { %634 = vmatpush.bf16.msra.mxu2 %v1075_v26  ;;  %v882_v26 = vor.u32 %v1053_v21, %v881_v20 }
  0x27   : > { %673 = vmatpush.bf16.msra.mxu3 %v1083_v27  ;;  %v886_v27 = vor.u32 %v1051_v22, %v883_v23 }
  0x28   : > { %557 = vmatpush.bf16.msra.mxu0 %v1058_v28  ;;  %v889_v28 = vld [vmem:[%s1213_s15 + $0xa0] sm:$0xf] }
  0x29   : > { %596 = vmatpush.bf16.msra.mxu1 %v1066_v29  ;;  %v1056_v29 = vld [vmem:[%s1213_s15 + $0xac] sm:$0xf0] }
  0x2a   : > { %635 = vmatpush.bf16.msra.mxu2 %v1074_v30  ;;  %v1054_v30 = vld [vmem:[%s1213_s15 + $0xa4] sm:$0xf]  ;;  %v890_v36 = vor.u32 %v1056_v29, %v889_v28 }
  0x2b   : > { %674 = vmatpush.bf16.msra.mxu3 %v1082_v31  ;;  %558 = vmatmul.bf16.vlgmr.msra.gmra.mxu0 %v810_v40  ;;  %v891_v31 = vld [vmem:[%s1213_s15 + $0xb0] sm:$0xf0] }
  0x2c   : > { %597 = vmatmul.bf16.vlgmr.msra.gmra.mxu1 %v814_v41  ;;  %v894_v37 = vor.u32 %v1054_v30, %v891_v31 }
  0x2d   : > { %636 = vmatmul.bf16.vlgmr.msra.gmra.mxu2 %v818_v42 }
  0x2e   : > { %675 = vmatmul.bf16.vlgmr.msra.gmra.mxu3 %v822_v43 }
  0x3b   : > { %563 = vmatmul.bf16.gmra.mxu0 %v826_v52 }
  0x3c   : > { %602 = vmatmul.bf16.gmra.mxu1 %v830_v53 }
  0x3d   : > { %641 = vmatmul.bf16.gmra.mxu2 %v834_v54 }
  0x3e   : > { %680 = vmatmul.bf16.gmra.mxu3 %v838_v55 }
  0x4b   : > { %568 = vmatmul.bf16.gmra.mxu0 %v842_v0 }
  0x4c   : > { %607 = vmatmul.bf16.gmra.mxu1 %v846_v1 }
  0x4d   : > { %646 = vmatmul.bf16.gmra.mxu2 %v850_v2 }
  0x4e   : > { %685 = vmatmul.bf16.gmra.mxu3 %v854_v3 }
  0x5b   : > { %573 = vmatmul.bf16.gmra.mxu0 %v858_v12 }
  0x5c   : > { %612 = vmatmul.bf16.gmra.mxu1 %v862_v13 }
  0x5d   : > { %651 = vmatmul.bf16.gmra.mxu2 %v866_v14 }
  0x5e   : > { %690 = vmatmul.bf16.gmra.mxu3 %v870_v15 }
  0x6b   : > { %578 = vmatmul.bf16.gmra.mxu0 %v874_v24 }
  0x6c   : > { %617 = vmatmul.bf16.gmra.mxu1 %v878_v25 }
  0x6d   : > { %656 = vmatmul.bf16.gmra.mxu2 %v882_v26 }
  0x6e   : > { %695 = vmatmul.bf16.gmra.mxu3 %v886_v27 }
  0x7b   : > { %583 = vmatmul.bf16.gmra.mxu0 %v890_v36 }
  0x7c   : > { %622 = vmatmul.bf16.gmra.mxu1 %v894_v37 }
  0x7d   : > { %661 = vmatmul.bf16.gmra.mxu2 %v898_v38 }
  0x7e   : > { %700 = vmatmul.bf16.gmra.mxu3 %v902_v39 }
  0xa8   : > { %v559_v40 = vpop.f32.mrf.mxu0 }
  0xa9   : > { %v598_v41 = vpop.f32.mrf.mxu1 }
  0xaa   : > { %v599_v42 = vadd.f32 %v598_v41, %v559_v40 }
  0xb0   : > { %v637_v43 = vpop.f32.mrf.mxu2  ;;  %v561_v46 = vpop.f32.mrf.mxu0 }
  0xb1   : > { %v676_v44 = vpop.f32.mrf.mxu3  ;;  %v638_v45 = vadd.f32 %v637_v43, %v599_v42  ;;  %v600_v47 = vpop.f32.mrf.mxu1 }
  0xb2   : > { %v601_v51 = vadd.f32 %v600_v47, %v561_v46 }
  0xb3   : > { %v677_v48 = vadd.f32 %v676_v44, %v638_v45 }
  0xb5   : > { %v706_v49 = vmax.f32 %v677_v48, 0.0 }
  0xb7   : > { %v718_v50 = vpack.c.bf16 %v706_v49, %v706_v49 }
  0xb8   : > { %v639_v52 = vpop.f32.mrf.mxu2  ;;  %v564_v55 = vpop.f32.mrf.mxu0 }
  0xb9   : > { %v678_v53 = vpop.f32.mrf.mxu3  ;;  %731 = vst.msk [vmem:[%s1285_s30] sm:$0xf] %vm730_vm0, %v718_v50  ;;  %v640_v54 = vadd.f32 %v639_v52, %v601_v51  ;;  %v603_v56 = vpop.f32.mrf.mxu1 }
  0xba   : > { %v604_v59 = vadd.f32 %v603_v56, %v564_v55 }
  0xbb   : > { %v679_v57 = vadd.f32 %v678_v53, %v640_v54 }
  0xbd   : > { %v707_v58 = vmax.f32 %v679_v57, 0.0 }
  0xbf   : > { %v719_v60 = vpack.c.bf16 %v707_v58, %v707_v58 }
  0xc0   : > { %v642_v61 = vpop.f32.mrf.mxu2  ;;  %v566_v0 = vpop.f32.mrf.mxu0 }
  0xc1   : > { %v681_v62 = vpop.f32.mrf.mxu3  ;;  %732 = vst.msk [vmem:[%s1285_s30 + $0x4] sm:$0xf] %vm730_vm0, %v719_v60  ;;  %v643_v63 = vadd.f32 %v642_v61, %v604_v59  ;;  %v605_v1 = vpop.f32.mrf.mxu1 }
  0xc2   : > { %v606_v5 = vadd.f32 %v605_v1, %v566_v0 }
  0xc3   : > { %v682_v2 = vadd.f32 %v681_v62, %v643_v63 }
  0xc5   : > { %v708_v3 = vmax.f32 %v682_v2, 0.0 }
  0xc7   : > { %v720_v4 = vpack.c.bf16 %v708_v3, %v708_v3 }
  0xc8   : > { %v644_v6 = vpop.f32.mrf.mxu2  ;;  %v569_v9 = vpop.f32.mrf.mxu0 }
  0xc9   : > { %v683_v7 = vpop.f32.mrf.mxu3  ;;  %733 = vst.msk [vmem:[%s1285_s30 + $0x8] sm:$0xf] %vm730_vm0, %v720_v4  ;;  %v645_v8 = vadd.f32 %v644_v6, %v606_v5  ;;  %v608_v10 = vpop.f32.mrf.mxu1 }
  0xca   : > { %v609_v13 = vadd.f32 %v608_v10, %v569_v9 }
  0xcb   : > { %v684_v11 = vadd.f32 %v683_v7, %v645_v8 }
  0xcd   : > { %v709_v12 = vmax.f32 %v684_v11, 0.0 }
  0xcf   : > { %v721_v14 = vpack.c.bf16 %v709_v12, %v709_v12 }
  0xd0   : > { %v647_v15 = vpop.f32.mrf.mxu2  ;;  %v571_v18 = vpop.f32.mrf.mxu0 }
  0xd1   : > { %v686_v16 = vpop.f32.mrf.mxu3  ;;  %734 = vst.msk [vmem:[%s1285_s30 + $0xc] sm:$0xf] %vm730_vm0, %v721_v14  ;;  %v648_v17 = vadd.f32 %v647_v15, %v609_v13  ;;  %v610_v19 = vpop.f32.mrf.mxu1 }
  0xd2   : > { %v611_v23 = vadd.f32 %v610_v19, %v571_v18 }
  0xd3   : > { %v687_v20 = vadd.f32 %v686_v16, %v648_v17 }
  0xd5   : > { %v710_v21 = vmax.f32 %v687_v20, 0.0 }
  0xd7   : > { %v722_v22 = vpack.c.bf16 %v710_v21, %v710_v21 }
  0xd8   : > { %v649_v24 = vpop.f32.mrf.mxu2  ;;  %v574_v27 = vpop.f32.mrf.mxu0 }
  0xd9   : > { %v688_v25 = vpop.f32.mrf.mxu3  ;;  %735 = vst.msk [vmem:[%s1285_s30 + $0x10] sm:$0xf] %vm730_vm0, %v722_v22  ;;  %v650_v26 = vadd.f32 %v649_v24, %v611_v23  ;;  %v613_v28 = vpop.f32.mrf.mxu1 }
  0xda   : > { %v614_v31 = vadd.f32 %v613_v28, %v574_v27 }
  0xdb   : > { %v689_v29 = vadd.f32 %v688_v25, %v650_v26 }
  0xdd   : > { %v711_v30 = vmax.f32 %v689_v29, 0.0 }
  0xdf   : > { %v723_v32 = vpack.c.bf16 %v711_v30, %v711_v30 }
  0xe0   : > { %v652_v33 = vpop.f32.mrf.mxu2  ;;  %v576_v36 = vpop.f32.mrf.mxu0 }
  0xe1   : > { %v691_v34 = vpop.f32.mrf.mxu3  ;;  %736 = vst.msk [vmem:[%s1285_s30 + $0x14] sm:$0xf] %vm730_vm0, %v723_v32  ;;  %v653_v35 = vadd.f32 %v652_v33, %v614_v31  ;;  %v615_v37 = vpop.f32.mrf.mxu1 }
  0xe2   : > { %v616_v41 = vadd.f32 %v615_v37, %v576_v36 }
  0xe3   : > { %v692_v38 = vadd.f32 %v691_v34, %v653_v35 }
  0xe5   : > { %v712_v39 = vmax.f32 %v692_v38, 0.0 }
  0xe7   : > { %v724_v40 = vpack.c.bf16 %v712_v39, %v712_v39 }
  0xe8   : > { %v654_v42 = vpop.f32.mrf.mxu2  ;;  %v579_v45 = vpop.f32.mrf.mxu0 }
  0xe9   : > { %v693_v43 = vpop.f32.mrf.mxu3  ;;  %737 = vst.msk [vmem:[%s1285_s30 + $0x18] sm:$0xf] %vm730_vm0, %v724_v40  ;;  %v655_v44 = vadd.f32 %v654_v42, %v616_v41  ;;  %v618_v46 = vpop.f32.mrf.mxu1 }
  0xea   : > { %v619_v49 = vadd.f32 %v618_v46, %v579_v45 }
  0xeb   : > { %v694_v47 = vadd.f32 %v693_v43, %v655_v44 }
  0xed   : > { %v713_v48 = vmax.f32 %v694_v47, 0.0 }
  0xef   : > { %v725_v50 = vpack.c.bf16 %v713_v48, %v713_v48 }
  0xf0   : > { %v657_v51 = vpop.f32.mrf.mxu2  ;;  %v581_v54 = vpop.f32.mrf.mxu0 }
  0xf1   : > { %v696_v52 = vpop.f32.mrf.mxu3  ;;  %738 = vst.msk [vmem:[%s1285_s30 + $0x1c] sm:$0xf] %vm730_vm0, %v725_v50  ;;  %v658_v53 = vadd.f32 %v657_v51, %v619_v49  ;;  %v620_v55 = vpop.f32.mrf.mxu1 }
  0xf2   : > { %v621_v59 = vadd.f32 %v620_v55, %v581_v54 }
  0xf3   : > { %v697_v56 = vadd.f32 %v696_v52, %v658_v53 }
  0xf5   : > { %v714_v57 = vmax.f32 %v697_v56, 0.0 }
  0xf7   : > { %v726_v58 = vpack.c.bf16 %v714_v57, %v714_v57 }
  0xf8   : > { %v659_v60 = vpop.f32.mrf.mxu2  ;;  %v584_v63 = vpop.f32.mrf.mxu0 }
  0xf9   : > { %v698_v61 = vpop.f32.mrf.mxu3  ;;  %739 = vst.msk [vmem:[%s1285_s30 + $0x20] sm:$0xf] %vm730_vm0, %v726_v58  ;;  %v660_v62 = vadd.f32 %v659_v60, %v621_v59  ;;  %v623_v0 = vpop.f32.mrf.mxu1 }
  0xfa   : > { %v624_v3 = vadd.f32 %v623_v0, %v584_v63 }
  0xfb   : > { %v699_v1 = vadd.f32 %v698_v61, %v660_v62 }
  0xfd   : > { %v715_v2 = vmax.f32 %v699_v1, 0.0 }
  0xff   : > { %v727_v4 = vpack.c.bf16 %v715_v2, %v715_v2 }
 0x100   : > { %v662_v5 = vpop.f32.mrf.mxu2  ;;  %v586_v9 = vpop.f32.mrf.mxu0 }
 0x101   : > { %v701_v6 = vpop.f32.mrf.mxu3  ;;  %740 = vst.msk [vmem:[%s1285_s30 + $0x24] sm:$0xf] %vm730_vm0, %v727_v4  ;;  %v663_v7 = vadd.f32 %v662_v5, %v624_v3  ;;  %v625_v10 = vpop.f32.mrf.mxu1 }
 0x102   : > { %v626_v13 = vadd.f32 %v625_v10, %v586_v9 }
 0x103   : > { %v702_v8 = vadd.f32 %v701_v6, %v663_v7 }
 0x105   : > { %v716_v11 = vmax.f32 %v702_v8, 0.0 }
 0x107   : > { %v728_v12 = vpack.c.bf16 %v716_v11, %v716_v11 }
 0x108   : > { %v664_v14 = vpop.f32.mrf.mxu2 }
 0x109   : > { %741 = vst.msk [vmem:[%s1285_s30 + $0x28] sm:$0xf] %vm730_vm0, %v728_v12  ;;  %v665_v15 = vadd.f32 %v664_v14, %v626_v13  ;;  %v703_v16 = vpop.f32.mrf.mxu3 }
 0x10b   : > { %v704_v17 = vadd.f32 %v703_v16, %v665_v15 }
 0x10d   : > { %v717_v18 = vmax.f32 %v704_v17, 0.0 }
 0x10f   : > { %v729_v19 = vpack.c.bf16 %v717_v18, %v717_v18 }
 0x111   : > { %742 = vst.msk [vmem:[%s1285_s30 + $0x2c] sm:$0xf] %vm730_vm0, %v729_v19 }
 0x112 PF: > { %s12_s9 = sadd.s32 1, %s1104_s9  }
 0x113   : > { %p9_p4 = scmp.ge.s32.totalorder %s12_s9, 4  }
 0x115   :  { %11 = sbr.rel (!%p9_p4) target bundleno = 1 (0x1), region = 58 }

// kernel: dqn_forward.6
= control target key start
LH: loop header
LB: loop body
LE: loop exit
PB: predicated region body
PF: predicated region fallthrough
CT: control target
= control target key end

     0   :  { %s1145_s9 = smov 0   ;;  %s1344_s0 = inlined_call_operand.vmem [shape: bf16[128,576], index: 0, kind: input, shape index: {}]   ;;  %s1345_s1 = inlined_call_operand.vmem [shape: bf16[576,64], index: 1, kind: input, shape index: {}]   ;;  %s1346_s2 = inlined_call_operand.vmem [shape: bf16[128,64], index: 2, kind: output, shape index: {}]  }
   0x1 LB: > { %s802_s10 = sadd.s32 4294967295, %s1128_s9   ;;  %p806_p0 = scmp.ge.s32.totalorder %s1128_s9, 1  ;;  %s1128_s9 = sphi %s1145_s9, %s12_s9  }
   0x2   : > { %p114_p1 = scmp.lt.s32.totalorder %s1128_s9, 3 }
   0x4   : > { %p115_p2 = pnand %p806_p0, %p114_p1 }
   0x5   : > { %s807_s21 = sshll.u32 (!%p115_p2), %s802_s10, 3 }
   0x6   : > { %118 = sbr.rel (%p115_p2) target bundleno = 274 (0x112), region = 28  ;;  %p138_p3 = scmp.lt.s32.totalorder (!%p115_p2), %s807_s21, 15 }
   0xb   : > { %v1068_v0 = vld [vmem:[%s1345_s1 + $0x38] sm:$0xff]  ;;  %v1067_v1 = vld [vmem:[%s1345_s1 + $0x30] sm:$0xff]  ;;  %v1066_v4 = vld [vmem:[%s1345_s1 + $0x28] sm:$0xff]  ;;  %s1348_s21 = smov (!%p138_p3, %s807_s21), 15  ;;  %vm563_vm0 = vcmask 523264   ;;  %vm737_vm1 = vcmask 519168  }
   0xc   : > { %1097 = vmatpush.bf16.msra.mxu1 %v1068_v0  ;;  %1098 = vmatpush.bf16.msra.mxu2 %v1068_v0  ;;  %v1092_v2 = vld [vmem:[%s1345_s1 + $0xf8] sm:$0xff]  ;;  %v1091_v3 = vld [vmem:[%s1345_s1 + $0xf0] sm:$0xff]  ;;  %v1090_v5 = vld [vmem:[%s1345_s1 + $0xe8] sm:$0xff]  ;;  %s1113_s6 = smul.u32 20, %s1348_s21 }
   0xd   : > { %576 = vmatpush.bf16.msra.mxu0 %v1068_v0  ;;  %663 = vmatpush.bf16.msra.mxu3 %v1092_v2  ;;  %v1065_v6 = vld [vmem:[%s1345_s1 + $0x20] sm:$0xff]  ;;  %v1064_v8 = vld [vmem:[%s1345_s1 + $0x18] sm:$0xff]  ;;  %v1063_v10 = vld [vmem:[%s1345_s1 + $0x10] sm:$0xff] }
   0xe   : > { %v1089_v7 = vld [vmem:[%s1345_s1 + $0xe0] sm:$0xff]  ;;  %v1088_v9 = vld [vmem:[%s1345_s1 + $0xd8] sm:$0xff]  ;;  %v1087_v11 = vld [vmem:[%s1345_s1 + $0xd0] sm:$0xff]  ;;  %s1198_s14 = scalar_lea.vmem %s1344_s0, %s1113_s6 }
   0xf   : > { %v1062_v12 = vld [vmem:[%s1345_s1 + $0x8] sm:$0xff]  ;;  %v1061_v14 = vld [vmem:[%s1345_s1] sm:$0xff]  ;;  %v1048_v16 = vld [vmem:[%s1198_s14 + $0x38] sm:$0xf0] }
  0x10   : > { %1099 = vmatpush.bf16.msra.mxu1 %v1067_v1  ;;  %1100 = vmatpush.bf16.msra.mxu2 %v1067_v1  ;;  %v1086_v13 = vld [vmem:[%s1345_s1 + $0xc8] sm:$0xff]  ;;  %v873_v17 = vld [vmem:[%s1198_s14 + $0x78] sm:$0xf]  ;;  %v813_v21 = vld [vmem:[%s1198_s14] sm:$0xf] }
  0x11   : > { %577 = vmatpush.bf16.msra.mxu0 %v1067_v1  ;;  %664 = vmatpush.bf16.msra.mxu3 %v1091_v3  ;;  %v833_v15 = vld [vmem:[%s1198_s14 + $0x28] sm:$0xf]  ;;  %v1058_v18 = vld [vmem:[%s1198_s14 + $0x88] sm:$0xf0]  ;;  %v1084_v19 = vld [vmem:[%s1345_s1 + $0xb8] sm:$0xff] }
  0x12   : > { %v1076_v20 = vld [vmem:[%s1345_s1 + $0x78] sm:$0xff]  ;;  %v1085_v22 = vld [vmem:[%s1345_s1 + $0xc0] sm:$0xff]  ;;  %v834_v23 = vor.u32 %v1048_v16, %v833_v15  ;;  %v874_v24 = vor.u32 %v1058_v18, %v873_v17  ;;  %v1043_v25 = vld [vmem:[%s1198_s14 + $0x10] sm:$0xf0] }
  0x13   : > { %v1042_v26 = vld [vmem:[%s1198_s14 + $0xc] sm:$0xf]  ;;  %v823_v27 = vld [vmem:[%s1198_s14 + $0x1c] sm:$0xf0]  ;;  %v1096_v28 = vld [vmem:[%s1345_s1 + $0x118] sm:$0xff]  ;;  %v814_v31 = vor.u32 %v1043_v25, %v813_v21 }
  0x14   : > { %1101 = vmatpush.bf16.msra.mxu1 %v1066_v4  ;;  %1102 = vmatpush.bf16.msra.mxu2 %v1066_v4  ;;  %v1083_v29 = vld [vmem:[%s1345_s1 + $0xb0] sm:$0xff]  ;;  %v826_v32 = vor.u32 %v1042_v26, %v823_v27  ;;  %v1082_v34 = vld [vmem:[%s1345_s1 + $0xa8] sm:$0xff]  ;;  %v1081_v37 = vld [vmem:[%s1345_s1 + $0xa0] sm:$0xff] }
  0x15   : > { %578 = vmatpush.bf16.msra.mxu0 %v1066_v4  ;;  %665 = vmatpush.bf16.msra.mxu3 %v1090_v5  ;;  %v1075_v30 = vld [vmem:[%s1345_s1 + $0x70] sm:$0xff]  ;;  %v1074_v35 = vld [vmem:[%s1345_s1 + $0x68] sm:$0xff]  ;;  %v1073_v38 = vld [vmem:[%s1345_s1 + $0x60] sm:$0xff] }
  0x16   : > { %v1095_v33 = vld [vmem:[%s1345_s1 + $0x110] sm:$0xff]  ;;  %v1094_v36 = vld [vmem:[%s1345_s1 + $0x108] sm:$0xff]  ;;  %v1053_v40 = vld [vmem:[%s1198_s14 + $0x60] sm:$0xf0] }
  0x17   : > { %v853_v39 = vld [vmem:[%s1198_s14 + $0x50] sm:$0xf]  ;;  %v1093_v41 = vld [vmem:[%s1345_s1 + $0x100] sm:$0xff]  ;;  %v1080_v42 = vld [vmem:[%s1345_s1 + $0x98] sm:$0xff] }
  0x18   : > { %1103 = vmatpush.bf16.msra.mxu1 %v1065_v6  ;;  %1104 = vmatpush.bf16.msra.mxu2 %v1065_v6  ;;  %v1072_v43 = vld [vmem:[%s1345_s1 + $0x58] sm:$0xff]  ;;  %v829_v44 = vld [vmem:[%s1198_s14 + $0x10] sm:$0xf]  ;;  %v854_v45 = vor.u32 %v1053_v40, %v853_v39  ;;  %v1045_v46 = vld [vmem:[%s1198_s14 + $0x20] sm:$0xf0] }
  0x19   : > { %579 = vmatpush.bf16.msra.mxu0 %v1065_v6  ;;  %666 = vmatpush.bf16.msra.mxu3 %v1089_v7  ;;  %v1047_v47 = vld [vmem:[%s1198_s14 + $0x34] sm:$0xf]  ;;  %v843_v48 = vld [vmem:[%s1198_s14 + $0x44] sm:$0xf0]  ;;  %v830_v51 = vor.u32 %v1045_v46, %v829_v44  ;;  %v1077_v55 = vld [vmem:[%s1345_s1 + $0x80] sm:$0xff] }
  0x1a   : > { %v1079_v49 = vld [vmem:[%s1345_s1 + $0x90] sm:$0xff]  ;;  %v846_v52 = vor.u32 %v1047_v47, %v843_v48  ;;  %v1078_v53 = vld [vmem:[%s1345_s1 + $0x88] sm:$0xff]  ;;  %v1069_v56 = vld [vmem:[%s1345_s1 + $0x40] sm:$0xff] }
  0x1b   : > { %v1071_v50 = vld [vmem:[%s1345_s1 + $0x50] sm:$0xff]  ;;  %v1070_v54 = vld [vmem:[%s1345_s1 + $0x48] sm:$0xff]  ;;  %v1044_v58 = vld [vmem:[%s1198_s14 + $0x18] sm:$0xf0] }
  0x1c   : > { %1105 = vmatpush.bf16.msra.mxu1 %v1064_v8  ;;  %1106 = vmatpush.bf16.msra.mxu2 %v1064_v8  ;;  %v821_v57 = vld [vmem:[%s1198_s14 + $0x8] sm:$0xf]  ;;  %v1041_v60 = vld [vmem:[%s1198_s14 + $0x4] sm:$0xf]  ;;  %v815_v61 = vld [vmem:[%s1198_s14 + $0x14] sm:$0xf0] }
  0x1d   : > { %580 = vmatpush.bf16.msra.mxu0 %v1064_v8  ;;  %667 = vmatpush.bf16.msra.mxu3 %v1088_v9  ;;  %v822_v59 = vor.u32 %v1044_v58, %v821_v57  ;;  %v849_v62 = vld [vmem:[%s1198_s14 + $0x38] sm:$0xf]  ;;  %v818_v63 = vor.u32 %v1041_v60, %v815_v61  ;;  %v1050_v0 = vld [vmem:[%s1198_s14 + $0x48] sm:$0xf0]  ;;  %v1052_v1 = vld [vmem:[%s1198_s14 + $0x5c] sm:$0xf] }
  0x1e   : > { %v863_v2 = vld [vmem:[%s1198_s14 + $0x6c] sm:$0xf0]  ;;  %v850_v3 = vor.u32 %v1050_v0, %v849_v62  ;;  %v1049_v6 = vld [vmem:[%s1198_s14 + $0x40] sm:$0xf0]  ;;  %v1046_v8 = vld [vmem:[%s1198_s14 + $0x2c] sm:$0xf] }
  0x1f   : > { %v866_v4 = vor.u32 %v1052_v1, %v863_v2  ;;  %v841_v5 = vld [vmem:[%s1198_s14 + $0x30] sm:$0xf]  ;;  %v835_v9 = vld [vmem:[%s1198_s14 + $0x3c] sm:$0xf0]  ;;  %v861_v17 = vld [vmem:[%s1198_s14 + $0x58] sm:$0xf] }
  0x20   : > { %1107 = vmatpush.bf16.msra.mxu1 %v1063_v10  ;;  %1108 = vmatpush.bf16.msra.mxu2 %v1063_v10  ;;  %v842_v7 = vor.u32 %v1049_v6, %v841_v5  ;;  %v1054_v18 = vld [vmem:[%s1198_s14 + $0x68] sm:$0xf0]  ;;  %v855_v21 = vld [vmem:[%s1198_s14 + $0x64] sm:$0xf0]  ;;  %v881_v26 = vld [vmem:[%s1198_s14 + $0x80] sm:$0xf] }
  0x21   : > { %581 = vmatpush.bf16.msra.mxu0 %v1063_v10  ;;  %668 = vmatpush.bf16.msra.mxu3 %v1087_v11  ;;  %v869_v10 = vld [vmem:[%s1198_s14 + $0x60] sm:$0xf]  ;;  %v838_v11 = vor.u32 %v1046_v8, %v835_v9  ;;  %v1059_v27 = vld [vmem:[%s1198_s14 + $0x90] sm:$0xf0] }
  0x24   : > { %1109 = vmatpush.bf16.msra.mxu1 %v1062_v12  ;;  %1110 = vmatpush.bf16.msra.mxu2 %v1062_v12 }
  0x25   : > { %582 = vmatpush.bf16.msra.mxu0 %v1062_v12  ;;  %669 = vmatpush.bf16.msra.mxu3 %v1086_v13  ;;  %v1055_v12 = vld [vmem:[%s1198_s14 + $0x70] sm:$0xf0]  ;;  %v1057_v13 = vld [vmem:[%s1198_s14 + $0x84] sm:$0xf] }
  0x26   : > { %v870_v15 = vor.u32 %v1055_v12, %v869_v10 }
  0x28   : > { %1111 = vmatpush.bf16.msra.mxu1 %v1061_v14  ;;  %1112 = vmatpush.bf16.msra.mxu2 %v1061_v14 }
  0x29   : > { %583 = vmatpush.bf16.msra.mxu0 %v1061_v14  ;;  %670 = vmatpush.bf16.msra.mxu3 %v1085_v22  ;;  %v883_v14 = vld [vmem:[%s1198_s14 + $0x94] sm:$0xf0] }
  0x2a   : > { %v886_v16 = vor.u32 %v1057_v13, %v883_v14 }
  0x2b   : > { %589 = vmatmul.bf16.vlgmr.msra.gmra.mxu1 %v834_v23  ;;  %599 = vmatmul.bf16.vlgmr.msra.gmra.mxu2 %v874_v24  ;;  %v889_v23 = vld [vmem:[%s1198_s14 + $0x88] sm:$0xf]  ;;  %v1060_v24 = vld [vmem:[%s1198_s14 + $0x98] sm:$0xf0] }
  0x2c   : > { %634 = vmatpush.bf16.msrb.mxu2 %v1084_v19  ;;  %605 = vmatpush.bf16.msrb.mxu1 %v1076_v20  ;;  %v862_v19 = vor.u32 %v1054_v18, %v861_v17  ;;  %v1051_v20 = vld [vmem:[%s1198_s14 + $0x54] sm:$0xf]  ;;  %v890_v25 = vor.u32 %v1060_v24, %v889_v23 }
  0x2d   : > { %696 = vmatpush.bf16.msrb.mxu0 %v1096_v28  ;;  %671 = vmatmul.bf16.vlgmr.msra.gmra.mxu3 %v826_v32  ;;  %v858_v22 = vor.u32 %v1051_v20, %v855_v21  ;;  %v882_v28 = vor.u32 %v1059_v27, %v881_v26 }
  0x2e   : > { %584 = vmatmul.bf16.vlgmr.msra.gmra.mxu0 %v814_v31 }
  0x30   : > { %635 = vmatpush.bf16.msrb.mxu2 %v1083_v29  ;;  %606 = vmatpush.bf16.msrb.mxu1 %v1075_v30  ;;  %v1056_v29 = vld [vmem:[%s1198_s14 + $0x7c] sm:$0xf]  ;;  %v875_v30 = vld [vmem:[%s1198_s14 + $0x8c] sm:$0xf0]  ;;  %s810_s14 = sshll.u32 %s1348_s21, 2 }
  0x31   : > { %697 = vmatpush.bf16.msrb.mxu0 %v1095_v33  ;;  %v878_v31 = vor.u32 %v1056_v29, %v875_v30  ;;  %s1321_s12 = scalar_lea.vmem %s1346_s2, %s810_s14 }
  0x34   : > { %636 = vmatpush.bf16.msrb.mxu2 %v1082_v34  ;;  %607 = vmatpush.bf16.msrb.mxu1 %v1074_v35 }
  0x35   : > { %698 = vmatpush.bf16.msrb.mxu0 %v1094_v36 }
  0x38   : > { %637 = vmatpush.bf16.msrb.mxu2 %v1081_v37  ;;  %608 = vmatpush.bf16.msrb.mxu1 %v1073_v38 }
  0x39   : > { %699 = vmatpush.bf16.msrb.mxu0 %v1093_v41 }
  0x3b   : > { %594 = vmatmul.bf16.gmra.mxu1 %v854_v45 }
  0x3c   : > { %638 = vmatpush.bf16.msrb.mxu2 %v1080_v42  ;;  %609 = vmatpush.bf16.msrb.mxu1 %v1072_v43 }
  0x3d   : > { %676 = vmatmul.bf16.gmra.mxu3 %v846_v52 }
  0x3e   : > { %1035 = vmatmul.msk.bf16.vlgmr.msrb.gmra.mxu0 %vm563_vm0, %v830_v51 }
  0x40   : > { %639 = vmatpush.bf16.msrb.mxu2 %v1079_v49  ;;  %610 = vmatpush.bf16.msrb.mxu1 %v1071_v50 }
  0x44   : > { %640 = vmatpush.bf16.msrb.mxu2 %v1078_v53  ;;  %611 = vmatpush.bf16.msrb.mxu1 %v1070_v54 }
  0x48   : > { %641 = vmatpush.bf16.msrb.mxu2 %v1077_v55  ;;  %612 = vmatpush.bf16.msrb.mxu1 %v1069_v56 }
  0x4b   : > { %642 = vmatmul.bf16.vlgmr.msrb.gmra.mxu2 %v822_v59  ;;  %613 = vmatmul.bf16.vlgmr.msrb.gmra.mxu1 %v818_v63 }
  0x4d   : > { %681 = vmatmul.bf16.gmra.mxu3 %v866_v4 }
  0x4e   : > { %1036 = vmatmul.msk.bf16.gmra.mxu0 %vm563_vm0, %v850_v3 }
  0x5b   : > { %647 = vmatmul.bf16.gmra.mxu2 %v842_v7  ;;  %618 = vmatmul.bf16.gmra.mxu1 %v838_v11 }
  0x5d   : > { %686 = vmatmul.bf16.gmra.mxu3 %v886_v16 }
  0x5e   : > { %1037 = vmatmul.msk.bf16.gmra.mxu0 %vm563_vm0, %v870_v15 }
  0x6b   : > { %652 = vmatmul.bf16.gmra.mxu2 %v862_v19  ;;  %623 = vmatmul.bf16.gmra.mxu1 %v858_v22 }
  0x6e   : > { %1038 = vmatmul.msk.bf16.gmra.mxu0 %vm563_vm0, %v890_v25 }
  0x7b   : > { %657 = vmatmul.bf16.gmra.mxu2 %v882_v28  ;;  %628 = vmatmul.bf16.gmra.mxu1 %v878_v31 }
  0xa8   : > { %v590_v32 = vpop.f32.mrf.mxu1 }
  0xab   : > { %v585_v33 = vpop.f32.mrf.mxu0 }
  0xae   : > { %v1313_v37 = vpop.f32.mrf.mxu2 }
  0xb0   : > { %v592_v34 = vpop.f32.mrf.mxu1  ;;  %v672_v38 = vpop.f32.mrf.mxu3 }
  0xb3   : > { %v587_v35 = vpop.f32.mrf.mxu0 }
  0xb6   : > { %v1315_v41 = vpop.f32.mrf.mxu2 }
  0xb8   : > { %v595_v36 = vpop.f32.mrf.mxu1  ;;  %v674_v44 = vpop.f32.mrf.mxu3 }
  0xbb   : > { %v701_v40 = vpop.f32.mrf.mxu0 }
  0xc0   : > { %v597_v39 = vpop.f32.mrf.mxu1  ;;  %v677_v54 = vpop.f32.mrf.mxu3 }
  0xc3   : > { %v703_v46 = vpop.f32.mrf.mxu0 }
  0xc8   : > { %v614_v42 = vpop.f32.mrf.mxu1  ;;  %v679_v2 = vpop.f32.mrf.mxu3 }
  0xc9   : > { %v615_v43 = vadd.f32 %v614_v42, %v585_v33 }
  0xcb   : > { %v706_v57 = vpop.f32.mrf.mxu0 }
  0xce   : > { %v643_v45 = vpop.f32.mrf.mxu2 }
  0xcf   : > { %v644_v47 = vadd.f32 %v643_v45, %v615_v43 }
  0xd0   : > { %v616_v50 = vpop.f32.mrf.mxu1  ;;  %v682_v13 = vpop.f32.mrf.mxu3 }
  0xd1   : > { %v673_v48 = vadd.f32 %v672_v38, %v644_v47  ;;  %v617_v51 = vadd.f32 %v616_v50, %v587_v35 }
  0xd3   : > { %v702_v49 = vadd.f32 %v701_v40, %v673_v48  ;;  %v708_v4 = vpop.f32.mrf.mxu0 }
  0xd5   : > { %v721_v52 = vmax.f32 %v702_v49, 0.0 }
  0xd6   : > { %v645_v53 = vpop.f32.mrf.mxu2 }
  0xd7   : > { %v729_v55 = vpack.c.bf16 %v721_v52, %v721_v52  ;;  %v646_v56 = vadd.f32 %v645_v53, %v617_v51 }
  0xd8   : > { %v619_v60 = vpop.f32.mrf.mxu1  ;;  %v684_v25 = vpop.f32.mrf.mxu3 }
  0xd9   : > { %738 = vst.msk [vmem:[%s1321_s12] sm:$0xf] %vm737_vm1, %v729_v55  ;;  %v675_v58 = vadd.f32 %v674_v44, %v646_v56  ;;  %v620_v61 = vadd.f32 %v619_v60, %v590_v32 }
  0xdb   : > { %v704_v59 = vadd.f32 %v703_v46, %v675_v58  ;;  %v711_v16 = vpop.f32.mrf.mxu0 }
  0xdd   : > { %v722_v62 = vmax.f32 %v704_v59, 0.0 }
  0xde   : > { %v648_v63 = vpop.f32.mrf.mxu2 }
  0xdf   : > { %v730_v0 = vpack.c.bf16 %v722_v62, %v722_v62  ;;  %v649_v1 = vadd.f32 %v648_v63, %v620_v61 }
  0xe0   : > { %v621_v6 = vpop.f32.mrf.mxu1  ;;  %v687_v38 = vpop.f32.mrf.mxu3 }
  0xe1   : > { %739 = vst.msk [vmem:[%s1321_s12 + $0x4] sm:$0xf] %vm737_vm1, %v730_v0  ;;  %v678_v3 = vadd.f32 %v677_v54, %v649_v1  ;;  %v622_v7 = vadd.f32 %v621_v6, %v592_v34 }
  0xe3   : > { %v707_v5 = vadd.f32 %v706_v57, %v678_v3  ;;  %v713_v28 = vpop.f32.mrf.mxu0 }
  0xe5   : > { %v723_v8 = vmax.f32 %v707_v5, 0.0 }
  0xe6   : > { %v650_v9 = vpop.f32.mrf.mxu2 }
  0xe7   : > { %v731_v10 = vpack.c.bf16 %v723_v8, %v723_v8  ;;  %v651_v11 = vadd.f32 %v650_v9, %v622_v7 }
  0xe8   : > { %v624_v15 = vpop.f32.mrf.mxu1 }
  0xe9   : > { %740 = vst.msk [vmem:[%s1321_s12 + $0x8] sm:$0xf] %vm737_vm1, %v731_v10  ;;  %v680_v12 = vadd.f32 %v679_v2, %v651_v11  ;;  %v625_v17 = vadd.f32 %v624_v15, %v595_v36 }
  0xeb   : > { %v709_v14 = vadd.f32 %v708_v4, %v680_v12 }
  0xed   : > { %v724_v18 = vmax.f32 %v709_v14, 0.0 }
  0xee   : > { %v653_v19 = vpop.f32.mrf.mxu2 }
  0xef   : > { %v732_v20 = vpack.c.bf16 %v724_v18, %v724_v18  ;;  %v654_v21 = vadd.f32 %v653_v19, %v625_v17 }
  0xf0   : > { %v626_v24 = vpop.f32.mrf.mxu1 }
  0xf1   : > { %741 = vst.msk [vmem:[%s1321_s12 + $0xc] sm:$0xf] %vm737_vm1, %v732_v20  ;;  %v683_v22 = vadd.f32 %v682_v13, %v654_v21  ;;  %v627_v26 = vadd.f32 %v626_v24, %v597_v39  ;;  %v716_v39 = vpop.f32.mrf.mxu0 }
  0xf3   : > { %v712_v23 = vadd.f32 %v711_v16, %v683_v22 }
  0xf5   : > { %v725_v27 = vmax.f32 %v712_v23, 0.0 }
  0xf6   : > { %v655_v29 = vpop.f32.mrf.mxu2 }
  0xf7   : > { %v733_v30 = vpack.c.bf16 %v725_v27, %v725_v27  ;;  %v656_v31 = vadd.f32 %v655_v29, %v627_v26 }
  0xf8   : > { %v629_v34 = vpop.f32.mrf.mxu1 }
  0xf9   : > { %742 = vst.msk [vmem:[%s1321_s12 + $0x10] sm:$0xf] %vm737_vm1, %v733_v30  ;;  %v685_v32 = vadd.f32 %v684_v25, %v656_v31  ;;  %v630_v35 = vadd.f32 %v629_v34, %v1313_v37  ;;  %v689_v37 = vpop.f32.mrf.mxu3  ;;  %v718_v53 = vpop.f32.mrf.mxu0 }
  0xfb   : > { %v714_v33 = vadd.f32 %v713_v28, %v685_v32 }
  0xfd   : > { %v726_v36 = vmax.f32 %v714_v33, 0.0 }
  0xfe   : > { %v658_v40 = vpop.f32.mrf.mxu2 }
  0xff   : > { %v734_v42 = vpack.c.bf16 %v726_v36, %v726_v36  ;;  %v659_v43 = vadd.f32 %v658_v40, %v630_v35 }
 0x100   : > { %v631_v46 = vpop.f32.mrf.mxu1 }
 0x101   : > { %743 = vst.msk [vmem:[%s1321_s12 + $0x14] sm:$0xf] %vm737_vm1, %v734_v42  ;;  %v688_v44 = vadd.f32 %v687_v38, %v659_v43  ;;  %v632_v47 = vadd.f32 %v631_v46, %v1315_v41 }
 0x103   : > { %v717_v45 = vadd.f32 %v716_v39, %v688_v44 }
 0x105   : > { %v727_v48 = vmax.f32 %v717_v45, 0.0 }
 0x106   : > { %v660_v49 = vpop.f32.mrf.mxu2 }
 0x107   : > { %v735_v50 = vpack.c.bf16 %v727_v48, %v727_v48  ;;  %v661_v51 = vadd.f32 %v660_v49, %v632_v47 }
 0x109   : > { %744 = vst.msk [vmem:[%s1321_s12 + $0x18] sm:$0xf] %vm737_vm1, %v735_v50  ;;  %v690_v52 = vadd.f32 %v689_v37, %v661_v51 }
 0x10b   : > { %v719_v54 = vadd.f32 %v718_v53, %v690_v52 }
 0x10d   : > { %v728_v55 = vmax.f32 %v719_v54, 0.0 }
 0x10f   : > { %v736_v56 = vpack.c.bf16 %v728_v55, %v728_v55 }
 0x111   : > { %745 = vst.msk [vmem:[%s1321_s12 + $0x1c] sm:$0xf] %vm737_vm1, %v736_v56 }
 0x112 PF: > { %s12_s9 = sadd.s32 1, %s1128_s9  }
 0x113   : > { %p9_p4 = scmp.ge.s32.totalorder %s12_s9, 4  }
 0x115   :  { %11 = sbr.rel (!%p9_p4) target bundleno = 1 (0x1), region = 58 }

// kernel: dqn_forward.7
= control target key start
LH: loop header
LB: loop body
LE: loop exit
PB: predicated region body
PF: predicated region fallthrough
CT: control target
= control target key end

     0   :  { %vm1737_vm0 = vcmask 523264   ;;  %vm2101_vm1 = vcmask 261120   ;;  %vm2131_vm2 = vcmask 56320   ;;  %s4031_s1 = inlined_call_operand.vmem [shape: bf16[3136,32], index: 1, kind: input, shape index: {}]   ;;  %s4032_s0 = inlined_call_operand.vmem [shape: bf16[16,3136], index: 0, kind: input, shape index: {}]   ;;  %s4033_s3 = inlined_call_operand.vmem [shape: f32[1,7], index: 3, kind: input, shape index: {}]   ;;  %s4034_s2 = inlined_call_operand.vmem [shape: f32[32,7], index: 2, kind: input, shape index: {}]   ;;  %s4035_s4 = inlined_call_operand.vmem [shape: f32[16,7], index: 4, kind: output, shape index: {}]  }
   0x1   :  { %v3057_v0 = vld [vmem:[%s4031_s1 + $0x38] sm:$0xff]  ;;  %v3056_v4 = vld [vmem:[%s4031_s1 + $0x30] sm:$0xff]  ;;  %v3055_v8 = vld [vmem:[%s4031_s1 + $0x28] sm:$0xff] }
   0x2   :  { %v3073_v1 = vld [vmem:[%s4031_s1 + $0xb8] sm:$0xff]  ;;  %1741 = vmatpush.bf16.msra.mxu0 %v3057_v0  ;;  %v3072_v5 = vld [vmem:[%s4031_s1 + $0xb0] sm:$0xff]  ;;  %v3071_v9 = vld [vmem:[%s4031_s1 + $0xa8] sm:$0xff] }
   0x3   :  { %v3081_v2 = vld [vmem:[%s4031_s1 + $0xf8] sm:$0xff]  ;;  %1769 = vmatpush.bf16.msra.mxu2 %v3073_v1  ;;  %v3080_v6 = vld [vmem:[%s4031_s1 + $0xf0] sm:$0xff]  ;;  %v3079_v10 = vld [vmem:[%s4031_s1 + $0xe8] sm:$0xff] }
   0x4   :  { %v3065_v3 = vld [vmem:[%s4031_s1 + $0x78] sm:$0xff]  ;;  %1783 = vmatpush.bf16.msra.mxu3 %v3081_v2  ;;  %v3064_v7 = vld [vmem:[%s4031_s1 + $0x70] sm:$0xff]  ;;  %v3063_v11 = vld [vmem:[%s4031_s1 + $0x68] sm:$0xff] }
   0x5   :  { %1755 = vmatpush.bf16.msra.mxu1 %v3065_v3  ;;  %v3054_v12 = vld [vmem:[%s4031_s1 + $0x20] sm:$0xff]  ;;  %v3053_v16 = vld [vmem:[%s4031_s1 + $0x18] sm:$0xff]  ;;  %v3052_v20 = vld [vmem:[%s4031_s1 + $0x10] sm:$0xff] }
   0x6   :  { %1742 = vmatpush.bf16.msra.mxu0 %v3056_v4  ;;  %v3070_v13 = vld [vmem:[%s4031_s1 + $0xa0] sm:$0xff]  ;;  %v3069_v17 = vld [vmem:[%s4031_s1 + $0x98] sm:$0xff]  ;;  %v3068_v21 = vld [vmem:[%s4031_s1 + $0x90] sm:$0xff] }
   0x7   :  { %1770 = vmatpush.bf16.msra.mxu2 %v3072_v5  ;;  %v3078_v14 = vld [vmem:[%s4031_s1 + $0xe0] sm:$0xff]  ;;  %v3077_v18 = vld [vmem:[%s4031_s1 + $0xd8] sm:$0xff]  ;;  %v3076_v22 = vld [vmem:[%s4031_s1 + $0xd0] sm:$0xff] }
   0x8   :  { %1784 = vmatpush.bf16.msra.mxu3 %v3080_v6  ;;  %v3062_v15 = vld [vmem:[%s4031_s1 + $0x60] sm:$0xff]  ;;  %v3061_v19 = vld [vmem:[%s4031_s1 + $0x58] sm:$0xff]  ;;  %v3060_v23 = vld [vmem:[%s4031_s1 + $0x50] sm:$0xff] }
   0x9   :  { %1756 = vmatpush.bf16.msra.mxu1 %v3064_v7  ;;  %v3051_v24 = vld [vmem:[%s4031_s1 + $0x8] sm:$0xff]  ;;  %v3050_v28 = vld [vmem:[%s4031_s1] sm:$0xff]  ;;  %v3089_v31 = vld [vmem:[%s4031_s1 + $0x138] sm:$0xff] }
   0xa   :  { %1743 = vmatpush.bf16.msra.mxu0 %v3055_v8  ;;  %v3067_v25 = vld [vmem:[%s4031_s1 + $0x88] sm:$0xff]  ;;  %v3066_v29 = vld [vmem:[%s4031_s1 + $0x80] sm:$0xff]  ;;  %v3105_v34 = vld [vmem:[%s4031_s1 + $0x1b8] sm:$0xff] }
   0xb   :  { %1771 = vmatpush.bf16.msra.mxu2 %v3071_v9  ;;  %v3075_v26 = vld [vmem:[%s4031_s1 + $0xc8] sm:$0xff]  ;;  %v3074_v30 = vld [vmem:[%s4031_s1 + $0xc0] sm:$0xff]  ;;  %v3113_v37 = vld [vmem:[%s4031_s1 + $0x1f8] sm:$0xff] }
   0xc   :  { %1785 = vmatpush.bf16.msra.mxu3 %v3079_v10  ;;  %v3059_v27 = vld [vmem:[%s4031_s1 + $0x48] sm:$0xff]  ;;  %v2140_v32 = vld [vmem:[%s4032_s0] sm:$0xf]  ;;  %v3037_v33 = vld [vmem:[%s4032_s0 + $0x60] sm:$0xf0] }
   0xd   :  { %1757 = vmatpush.bf16.msra.mxu1 %v3063_v11  ;;  %v2148_v35 = vld [vmem:[%s4032_s0 + $0x8] sm:$0xf]  ;;  %v3038_v36 = vld [vmem:[%s4032_s0 + $0x68] sm:$0xf0]  ;;  %v2150_v39 = vld [vmem:[%s4032_s0 + $0x6c] sm:$0xf0]  ;;  %v2141_v41 = vor.u32 %v3037_v33, %v2140_v32 }
   0xe   :  { %1744 = vmatpush.bf16.msra.mxu0 %v3054_v12  ;;  %v3026_v38 = vld [vmem:[%s4032_s0 + $0xc] sm:$0xf]  ;;  %v3058_v40 = vld [vmem:[%s4031_s1 + $0x40] sm:$0xff]  ;;  %v3097_v42 = vld [vmem:[%s4031_s1 + $0x178] sm:$0xff]  ;;  %v2149_v43 = vor.u32 %v3038_v36, %v2148_v35 }
   0xf   :  { %1772 = vmatpush.bf16.msra.mxu2 %v3070_v13  ;;  %v3025_v44 = vld [vmem:[%s4032_s0 + $0x4] sm:$0xf]  ;;  %v2142_v45 = vld [vmem:[%s4032_s0 + $0x64] sm:$0xf0]  ;;  %v3088_v46 = vld [vmem:[%s4031_s1 + $0x130] sm:$0xff]  ;;  %v2153_v47 = vor.u32 %v3026_v38, %v2150_v39 }
  0x10   :  { %1786 = vmatpush.bf16.msra.mxu3 %v3078_v14  ;;  %v3104_v48 = vld [vmem:[%s4031_s1 + $0x1b0] sm:$0xff]  ;;  %v2145_v50 = vor.u32 %v3025_v44, %v2142_v45  ;;  %v3087_v52 = vld [vmem:[%s4031_s1 + $0x128] sm:$0xff]  ;;  %v3086_v56 = vld [vmem:[%s4031_s1 + $0x120] sm:$0xff] }
  0x11   :  { %1758 = vmatpush.bf16.msra.mxu1 %v3062_v15  ;;  %v3112_v49 = vld [vmem:[%s4031_s1 + $0x1f0] sm:$0xff]  ;;  %v3103_v53 = vld [vmem:[%s4031_s1 + $0x1a8] sm:$0xff]  ;;  %v3102_v57 = vld [vmem:[%s4031_s1 + $0x1a0] sm:$0xff] }
  0x12   :  { %1745 = vmatpush.bf16.msra.mxu0 %v3053_v16  ;;  %v3096_v51 = vld [vmem:[%s4031_s1 + $0x170] sm:$0xff]  ;;  %v3111_v54 = vld [vmem:[%s4031_s1 + $0x1e8] sm:$0xff]  ;;  %v3110_v58 = vld [vmem:[%s4031_s1 + $0x1e0] sm:$0xff] }
  0x13   :  { %1773 = vmatpush.bf16.msra.mxu2 %v3069_v17  ;;  %v3095_v55 = vld [vmem:[%s4031_s1 + $0x168] sm:$0xff]  ;;  %v3094_v59 = vld [vmem:[%s4031_s1 + $0x160] sm:$0xff]  ;;  %v3085_v60 = vld [vmem:[%s4031_s1 + $0x118] sm:$0xff] }
  0x14   :  { %1787 = vmatpush.bf16.msra.mxu3 %v3077_v18  ;;  %v3101_v61 = vld [vmem:[%s4031_s1 + $0x198] sm:$0xff]  ;;  %v3084_v0 = vld [vmem:[%s4031_s1 + $0x110] sm:$0xff]  ;;  %v3083_v4 = vld [vmem:[%s4031_s1 + $0x108] sm:$0xff] }
  0x15   :  { %1759 = vmatpush.bf16.msra.mxu1 %v3061_v19  ;;  %v3109_v62 = vld [vmem:[%s4031_s1 + $0x1d8] sm:$0xff]  ;;  %v3100_v1 = vld [vmem:[%s4031_s1 + $0x190] sm:$0xff]  ;;  %v3099_v5 = vld [vmem:[%s4031_s1 + $0x188] sm:$0xff] }
  0x16   :  { %1746 = vmatpush.bf16.msra.mxu0 %v3052_v20  ;;  %v3093_v63 = vld [vmem:[%s4031_s1 + $0x158] sm:$0xff]  ;;  %v3108_v2 = vld [vmem:[%s4031_s1 + $0x1d0] sm:$0xff]  ;;  %v3107_v6 = vld [vmem:[%s4031_s1 + $0x1c8] sm:$0xff] }
  0x17   :  { %1774 = vmatpush.bf16.msra.mxu2 %v3068_v21  ;;  %v3092_v3 = vld [vmem:[%s4031_s1 + $0x150] sm:$0xff]  ;;  %v3091_v7 = vld [vmem:[%s4031_s1 + $0x148] sm:$0xff]  ;;  %v3082_v8 = vld [vmem:[%s4031_s1 + $0x100] sm:$0xff] }
  0x18   :  { %1788 = vmatpush.bf16.msra.mxu3 %v3076_v22  ;;  %v3098_v9 = vld [vmem:[%s4031_s1 + $0x180] sm:$0xff]  ;;  %v3121_v11 = vld [vmem:[%s4031_s1 + $0x238] sm:$0xff]  ;;  %v2156_v13 = vld [vmem:[%s4032_s0 + $0x10] sm:$0xf] }
  0x19   :  { %1760 = vmatpush.bf16.msra.mxu1 %v3060_v23  ;;  %v3106_v10 = vld [vmem:[%s4031_s1 + $0x1c0] sm:$0xff]  ;;  %v3137_v12 = vld [vmem:[%s4031_s1 + $0x2b8] sm:$0xff]  ;;  %v3039_v14 = vld [vmem:[%s4032_s0 + $0x70] sm:$0xf0] }
  0x1a   :  { %1747 = vmatpush.bf16.msra.mxu0 %v3051_v24  ;;  %v2164_v15 = vld [vmem:[%s4032_s0 + $0x18] sm:$0xf]  ;;  %v3040_v16 = vld [vmem:[%s4032_s0 + $0x78] sm:$0xf0]  ;;  %v2166_v19 = vld [vmem:[%s4032_s0 + $0x7c] sm:$0xf0]  ;;  %v2157_v23 = vor.u32 %v3039_v14, %v2156_v13 }
  0x1b   :  { %1775 = vmatpush.bf16.msra.mxu2 %v3067_v25  ;;  %v3145_v17 = vld [vmem:[%s4031_s1 + $0x2f8] sm:$0xff]  ;;  %v3090_v20 = vld [vmem:[%s4031_s1 + $0x140] sm:$0xff]  ;;  %v3027_v21 = vld [vmem:[%s4032_s0 + $0x14] sm:$0xf]  ;;  %v2165_v24 = vor.u32 %v3040_v16, %v2164_v15 }
  0x1c   :  { %1789 = vmatpush.bf16.msra.mxu3 %v3075_v26  ;;  %v3028_v18 = vld [vmem:[%s4032_s0 + $0x1c] sm:$0xf]  ;;  %v2158_v22 = vld [vmem:[%s4032_s0 + $0x74] sm:$0xf0]  ;;  %v3119_v32 = vld [vmem:[%s4031_s1 + $0x228] sm:$0xff] }
  0x1d   :  { %1761 = vmatpush.bf16.msra.mxu1 %v3059_v27  ;;  %v3129_v25 = vld [vmem:[%s4031_s1 + $0x278] sm:$0xff]  ;;  %v2169_v26 = vor.u32 %v3028_v18, %v2166_v19  ;;  %v2161_v27 = vor.u32 %v3027_v21, %v2158_v22  ;;  %v3135_v33 = vld [vmem:[%s4031_s1 + $0x2a8] sm:$0xff]  ;;  %v3118_v36 = vld [vmem:[%s4031_s1 + $0x220] sm:$0xff] }
  0x1e   :  { %1748 = vmatpush.bf16.msra.mxu0 %v3050_v28  ;;  %v3120_v28 = vld [vmem:[%s4031_s1 + $0x230] sm:$0xff]  ;;  %v3127_v35 = vld [vmem:[%s4031_s1 + $0x268] sm:$0xff]  ;;  %v3142_v38 = vld [vmem:[%s4031_s1 + $0x2e0] sm:$0xff] }
  0x1f   :  { %1776 = vmatpush.bf16.msra.mxu2 %v3066_v29  ;;  %v3136_v29 = vld [vmem:[%s4031_s1 + $0x2b0] sm:$0xff]  ;;  %v3126_v39 = vld [vmem:[%s4031_s1 + $0x260] sm:$0xff]  ;;  %v3167_v13 = vld [vmem:[%s4031_s1 + $0x3a8] sm:$0xff] }
  0x20   :  { %1790 = vmatpush.bf16.msra.mxu3 %v3074_v30  ;;  %v3144_v30 = vld [vmem:[%s4031_s1 + $0x2f0] sm:$0xff]  ;;  %v3175_v14 = vld [vmem:[%s4031_s1 + $0x3e8] sm:$0xff]  ;;  %v3150_v16 = vld [vmem:[%s4031_s1 + $0x320] sm:$0xff] }
  0x21   :  { %1762 = vmatpush.bf16.msra.mxu1 %v3058_v40  ;;  %1749 = vmatmul.bf16.vlgmr.msra.gmra.mxu0 %v2141_v41  ;;  %v3117_v40 = vld [vmem:[%s4031_s1 + $0x218] sm:$0xff]  ;;  %v3116_v44 = vld [vmem:[%s4031_s1 + $0x210] sm:$0xff]  ;;  %v3159_v15 = vld [vmem:[%s4031_s1 + $0x368] sm:$0xff] }
  0x22   :  { %1797 = vmatpush.bf16.msrb.mxu0 %v3089_v31  ;;  %1777 = vmatmul.bf16.vlgmr.msra.gmra.mxu2 %v2149_v43  ;;  %v3128_v31 = vld [vmem:[%s4031_s1 + $0x270] sm:$0xff]  ;;  %v3133_v41 = vld [vmem:[%s4031_s1 + $0x298] sm:$0xff]  ;;  %v3174_v18 = vld [vmem:[%s4031_s1 + $0x3e0] sm:$0xff] }
  0x23   :  { %1825 = vmatpush.bf16.msrb.mxu2 %v3105_v34  ;;  %1791 = vmatmul.bf16.vlgmr.msra.gmra.mxu3 %v2153_v47  ;;  %v3143_v34 = vld [vmem:[%s4031_s1 + $0x2e8] sm:$0xff]  ;;  %v3125_v43 = vld [vmem:[%s4031_s1 + $0x258] sm:$0xff]  ;;  %v3132_v45 = vld [vmem:[%s4031_s1 + $0x290] sm:$0xff] }
  0x24   :  { %1839 = vmatpush.bf16.msrb.mxu3 %v3113_v37  ;;  %1763 = vmatmul.bf16.vlgmr.msra.gmra.mxu1 %v2145_v50  ;;  %v3134_v37 = vld [vmem:[%s4031_s1 + $0x2a0] sm:$0xff]  ;;  %v3124_v47 = vld [vmem:[%s4031_s1 + $0x250] sm:$0xff]  ;;  %v3139_v50 = vld [vmem:[%s4031_s1 + $0x2c8] sm:$0xff] }
  0x25   :  { %1811 = vmatpush.bf16.msrb.mxu1 %v3097_v42  ;;  %v3141_v42 = vld [vmem:[%s4031_s1 + $0x2d8] sm:$0xff]  ;;  %v3158_v19 = vld [vmem:[%s4031_s1 + $0x360] sm:$0xff] }
  0x26   :  { %1798 = vmatpush.bf16.msrb.mxu0 %v3088_v46  ;;  %v3140_v46 = vld [vmem:[%s4031_s1 + $0x2d0] sm:$0xff]  ;;  %v3165_v21 = vld [vmem:[%s4031_s1 + $0x398] sm:$0xff] }
  0x27   :  { %1826 = vmatpush.bf16.msrb.mxu2 %v3104_v48  ;;  %v3115_v48 = vld [vmem:[%s4031_s1 + $0x208] sm:$0xff]  ;;  %v3173_v22 = vld [vmem:[%s4031_s1 + $0x3d8] sm:$0xff] }
  0x28   :  { %1840 = vmatpush.bf16.msrb.mxu3 %v3112_v49  ;;  %v3131_v49 = vld [vmem:[%s4031_s1 + $0x288] sm:$0xff] }
  0x29   :  { %1812 = vmatpush.bf16.msrb.mxu1 %v3096_v51  ;;  %v3123_v51 = vld [vmem:[%s4031_s1 + $0x248] sm:$0xff] }
  0x2a   :  { %1799 = vmatpush.bf16.msrb.mxu0 %v3087_v52  ;;  %v3114_v52 = vld [vmem:[%s4031_s1 + $0x200] sm:$0xff] }
  0x2b   :  { %1827 = vmatpush.bf16.msrb.mxu2 %v3103_v53  ;;  %v3130_v53 = vld [vmem:[%s4031_s1 + $0x280] sm:$0xff] }
  0x2c   :  { %1841 = vmatpush.bf16.msrb.mxu3 %v3111_v54  ;;  %v3138_v54 = vld [vmem:[%s4031_s1 + $0x2c0] sm:$0xff] }
  0x2d   :  { %1813 = vmatpush.bf16.msrb.mxu1 %v3095_v55  ;;  %v3153_v55 = vld [vmem:[%s4031_s1 + $0x338] sm:$0xff] }
  0x2e   :  { %1800 = vmatpush.bf16.msrb.mxu0 %v3086_v56  ;;  %v3169_v56 = vld [vmem:[%s4031_s1 + $0x3b8] sm:$0xff] }
  0x2f   :  { %1828 = vmatpush.bf16.msrb.mxu2 %v3102_v57  ;;  %v2172_v57 = vld [vmem:[%s4032_s0 + $0x20] sm:$0xf] }
  0x30   :  { %1842 = vmatpush.bf16.msrb.mxu3 %v3110_v58  ;;  %v3041_v58 = vld [vmem:[%s4032_s0 + $0x80] sm:$0xf0] }
  0x31   :  { %1814 = vmatpush.bf16.msrb.mxu1 %v3094_v59  ;;  %v2180_v59 = vld [vmem:[%s4032_s0 + $0x28] sm:$0xf] }
  0x32   :  { %1801 = vmatpush.bf16.msrb.mxu0 %v3085_v60  ;;  %v3042_v60 = vld [vmem:[%s4032_s0 + $0x88] sm:$0xf0] }
  0x33   :  { %1829 = vmatpush.bf16.msrb.mxu2 %v3101_v61  ;;  %v3177_v61 = vld [vmem:[%s4031_s1 + $0x3f8] sm:$0xff] }
  0x34   :  { %1843 = vmatpush.bf16.msrb.mxu3 %v3109_v62  ;;  %v3030_v62 = vld [vmem:[%s4032_s0 + $0x2c] sm:$0xf] }
  0x35   :  { %1815 = vmatpush.bf16.msrb.mxu1 %v3093_v63  ;;  %v2182_v63 = vld [vmem:[%s4032_s0 + $0x8c] sm:$0xf0] }
  0x36   :  { %1802 = vmatpush.bf16.msrb.mxu0 %v3084_v0  ;;  %v3122_v0 = vld [vmem:[%s4031_s1 + $0x240] sm:$0xff] }
  0x37   :  { %1830 = vmatpush.bf16.msrb.mxu2 %v3100_v1  ;;  %v3029_v1 = vld [vmem:[%s4032_s0 + $0x24] sm:$0xf] }
  0x38   :  { %1844 = vmatpush.bf16.msrb.mxu3 %v3108_v2  ;;  %v2174_v2 = vld [vmem:[%s4032_s0 + $0x84] sm:$0xf0] }
  0x39   :  { %1816 = vmatpush.bf16.msrb.mxu1 %v3092_v3  ;;  %v2173_v3 = vor.u32 %v3041_v58, %v2172_v57  ;;  %v3199_v57 = vld [vmem:[%s4031_s1 + $0x4a8] sm:$0xff] }
  0x3a   :  { %1803 = vmatpush.bf16.msrb.mxu0 %v3083_v4  ;;  %v2181_v4 = vor.u32 %v3042_v60, %v2180_v59  ;;  %v3207_v58 = vld [vmem:[%s4031_s1 + $0x4e8] sm:$0xff]  ;;  %v3182_v60 = vld [vmem:[%s4031_s1 + $0x420] sm:$0xff] }
  0x3b   :  { %1831 = vmatpush.bf16.msrb.mxu2 %v3099_v5  ;;  %v3161_v5 = vld [vmem:[%s4031_s1 + $0x378] sm:$0xff]  ;;  %v3191_v59 = vld [vmem:[%s4031_s1 + $0x468] sm:$0xff] }
  0x3c   :  { %1845 = vmatpush.bf16.msrb.mxu3 %v3107_v6  ;;  %v2185_v6 = vor.u32 %v3030_v62, %v2182_v63  ;;  %v3206_v62 = vld [vmem:[%s4031_s1 + $0x4e0] sm:$0xff] }
  0x3d   :  { %1817 = vmatpush.bf16.msrb.mxu1 %v3091_v7  ;;  %v2177_v7 = vor.u32 %v3029_v1, %v2174_v2  ;;  %v3190_v63 = vld [vmem:[%s4031_s1 + $0x460] sm:$0xff]  ;;  %v3197_v1 = vld [vmem:[%s4031_s1 + $0x498] sm:$0xff] }
  0x3e   :  { %1804 = vmatpush.bf16.msrb.mxu0 %v3082_v8  ;;  %v3152_v8 = vld [vmem:[%s4031_s1 + $0x330] sm:$0xff]  ;;  %v3205_v2 = vld [vmem:[%s4031_s1 + $0x4d8] sm:$0xff] }
  0x3f   :  { %1832 = vmatpush.bf16.msrb.mxu2 %v3098_v9  ;;  %v3168_v9 = vld [vmem:[%s4031_s1 + $0x3b0] sm:$0xff] }
  0x40   :  { %1846 = vmatpush.bf16.msrb.mxu3 %v3106_v10  ;;  %v3176_v10 = vld [vmem:[%s4031_s1 + $0x3f0] sm:$0xff] }
  0x41   :  { %1818 = vmatpush.bf16.msrb.mxu1 %v3090_v20  ;;  %1805 = vmatmul.bf16.vlgmr.msrb.gmra.mxu0 %v2157_v23  ;;  %v3149_v20 = vld [vmem:[%s4031_s1 + $0x318] sm:$0xff] }
  0x42   :  { %1853 = vmatpush.bf16.msra.mxu0 %v3121_v11  ;;  %1833 = vmatmul.bf16.vlgmr.msrb.gmra.mxu2 %v2165_v24  ;;  %v3160_v11 = vld [vmem:[%s4031_s1 + $0x370] sm:$0xff]  ;;  %v3157_v23 = vld [vmem:[%s4031_s1 + $0x358] sm:$0xff] }
  0x43   :  { %1881 = vmatpush.bf16.msra.mxu2 %v3137_v12  ;;  %1847 = vmatmul.bf16.vlgmr.msrb.gmra.mxu3 %v2169_v26  ;;  %v3151_v12 = vld [vmem:[%s4031_s1 + $0x328] sm:$0xff]  ;;  %v3148_v24 = vld [vmem:[%s4031_s1 + $0x310] sm:$0xff] }
  0x44   :  { %1895 = vmatpush.bf16.msra.mxu3 %v3145_v17  ;;  %1819 = vmatmul.bf16.vlgmr.msrb.gmra.mxu1 %v2161_v27  ;;  %v3166_v17 = vld [vmem:[%s4031_s1 + $0x3a0] sm:$0xff]  ;;  %v3172_v26 = vld [vmem:[%s4031_s1 + $0x3d0] sm:$0xff] }
  0x45   :  { %1867 = vmatpush.bf16.msra.mxu1 %v3129_v25  ;;  %v3164_v25 = vld [vmem:[%s4031_s1 + $0x390] sm:$0xff] }
  0x46   :  { %1854 = vmatpush.bf16.msra.mxu0 %v3120_v28  ;;  %v3156_v27 = vld [vmem:[%s4031_s1 + $0x350] sm:$0xff]  ;;  %v3147_v28 = vld [vmem:[%s4031_s1 + $0x308] sm:$0xff] }
  0x47   :  { %1882 = vmatpush.bf16.msra.mxu2 %v3136_v29  ;;  %v3163_v29 = vld [vmem:[%s4031_s1 + $0x388] sm:$0xff] }
  0x48   :  { %1896 = vmatpush.bf16.msra.mxu3 %v3144_v30  ;;  %v3171_v30 = vld [vmem:[%s4031_s1 + $0x3c8] sm:$0xff] }
  0x49   :  { %1868 = vmatpush.bf16.msra.mxu1 %v3128_v31  ;;  %v3155_v31 = vld [vmem:[%s4031_s1 + $0x348] sm:$0xff] }
  0x4a   :  { %1855 = vmatpush.bf16.msra.mxu0 %v3119_v32  ;;  %v3146_v32 = vld [vmem:[%s4031_s1 + $0x300] sm:$0xff] }
  0x4b   :  { %1883 = vmatpush.bf16.msra.mxu2 %v3135_v33  ;;  %v3162_v33 = vld [vmem:[%s4031_s1 + $0x380] sm:$0xff] }
  0x4c   :  { %1897 = vmatpush.bf16.msra.mxu3 %v3143_v34  ;;  %v3170_v34 = vld [vmem:[%s4031_s1 + $0x3c0] sm:$0xff] }
  0x4d   :  { %1869 = vmatpush.bf16.msra.mxu1 %v3127_v35  ;;  %v3185_v35 = vld [vmem:[%s4031_s1 + $0x438] sm:$0xff] }
  0x4e   :  { %1856 = vmatpush.bf16.msra.mxu0 %v3118_v36  ;;  %v3201_v36 = vld [vmem:[%s4031_s1 + $0x4b8] sm:$0xff] }
  0x4f   :  { %1884 = vmatpush.bf16.msra.mxu2 %v3134_v37  ;;  %v2188_v37 = vld [vmem:[%s4032_s0 + $0x30] sm:$0xf] }
  0x50   :  { %1898 = vmatpush.bf16.msra.mxu3 %v3142_v38  ;;  %v3043_v38 = vld [vmem:[%s4032_s0 + $0x90] sm:$0xf0] }
  0x51   :  { %1870 = vmatpush.bf16.msra.mxu1 %v3126_v39  ;;  %v2196_v39 = vld [vmem:[%s4032_s0 + $0x38] sm:$0xf] }
  0x52   :  { %1857 = vmatpush.bf16.msra.mxu0 %v3117_v40  ;;  %v3044_v40 = vld [vmem:[%s4032_s0 + $0x98] sm:$0xf0] }
  0x53   :  { %1885 = vmatpush.bf16.msra.mxu2 %v3133_v41  ;;  %v3209_v41 = vld [vmem:[%s4031_s1 + $0x4f8] sm:$0xff] }
  0x54   :  { %1899 = vmatpush.bf16.msra.mxu3 %v3141_v42  ;;  %v3032_v42 = vld [vmem:[%s4032_s0 + $0x3c] sm:$0xf] }
  0x55   :  { %1871 = vmatpush.bf16.msra.mxu1 %v3125_v43  ;;  %v2198_v43 = vld [vmem:[%s4032_s0 + $0x9c] sm:$0xf0] }
  0x56   :  { %1858 = vmatpush.bf16.msra.mxu0 %v3116_v44  ;;  %v3154_v44 = vld [vmem:[%s4031_s1 + $0x340] sm:$0xff] }
  0x57   :  { %1886 = vmatpush.bf16.msra.mxu2 %v3132_v45  ;;  %v3031_v45 = vld [vmem:[%s4032_s0 + $0x34] sm:$0xf] }
  0x58   :  { %1900 = vmatpush.bf16.msra.mxu3 %v3140_v46  ;;  %v2190_v46 = vld [vmem:[%s4032_s0 + $0x94] sm:$0xf0] }
  0x59   :  { %1872 = vmatpush.bf16.msra.mxu1 %v3124_v47  ;;  %v2189_v47 = vor.u32 %v3043_v38, %v2188_v37  ;;  %v3231_v37 = vld [vmem:[%s4031_s1 + $0x5a8] sm:$0xff] }
  0x5a   :  { %1859 = vmatpush.bf16.msra.mxu0 %v3115_v48  ;;  %v2197_v48 = vor.u32 %v3044_v40, %v2196_v39  ;;  %v3239_v38 = vld [vmem:[%s4031_s1 + $0x5e8] sm:$0xff]  ;;  %v3214_v40 = vld [vmem:[%s4031_s1 + $0x520] sm:$0xff] }
  0x5b   :  { %1887 = vmatpush.bf16.msra.mxu2 %v3131_v49  ;;  %v3193_v49 = vld [vmem:[%s4031_s1 + $0x478] sm:$0xff]  ;;  %v3223_v39 = vld [vmem:[%s4031_s1 + $0x568] sm:$0xff] }
  0x5c   :  { %1901 = vmatpush.bf16.msra.mxu3 %v3139_v50  ;;  %v2201_v50 = vor.u32 %v3032_v42, %v2198_v43  ;;  %v3238_v42 = vld [vmem:[%s4031_s1 + $0x5e0] sm:$0xff] }
  0x5d   :  { %1873 = vmatpush.bf16.msra.mxu1 %v3123_v51  ;;  %v2193_v51 = vor.u32 %v3031_v45, %v2190_v46  ;;  %v3222_v43 = vld [vmem:[%s4031_s1 + $0x560] sm:$0xff]  ;;  %v3229_v45 = vld [vmem:[%s4031_s1 + $0x598] sm:$0xff] }
  0x5e   :  { %1860 = vmatpush.bf16.msra.mxu0 %v3114_v52  ;;  %v3184_v52 = vld [vmem:[%s4031_s1 + $0x430] sm:$0xff]  ;;  %v3237_v46 = vld [vmem:[%s4031_s1 + $0x5d8] sm:$0xff] }
  0x5f   :  { %1888 = vmatpush.bf16.msra.mxu2 %v3130_v53  ;;  %v3200_v53 = vld [vmem:[%s4031_s1 + $0x4b0] sm:$0xff] }
  0x60   :  { %1902 = vmatpush.bf16.msra.mxu3 %v3138_v54  ;;  %v3208_v54 = vld [vmem:[%s4031_s1 + $0x4f0] sm:$0xff] }
  0x61   :  { %1874 = vmatpush.bf16.msra.mxu1 %v3122_v0  ;;  %1861 = vmatmul.bf16.vlgmr.msra.gmra.mxu0 %v2173_v3  ;;  %v3181_v0 = vld [vmem:[%s4031_s1 + $0x418] sm:$0xff] }
  0x62   :  { %1909 = vmatpush.bf16.msrb.mxu0 %v3153_v55  ;;  %1889 = vmatmul.bf16.vlgmr.msra.gmra.mxu2 %v2181_v4  ;;  %v3192_v55 = vld [vmem:[%s4031_s1 + $0x470] sm:$0xff]  ;;  %v3189_v3 = vld [vmem:[%s4031_s1 + $0x458] sm:$0xff] }
  0x63   :  { %1937 = vmatpush.bf16.msrb.mxu2 %v3169_v56  ;;  %1903 = vmatmul.bf16.vlgmr.msra.gmra.mxu3 %v2185_v6  ;;  %v3183_v56 = vld [vmem:[%s4031_s1 + $0x428] sm:$0xff]  ;;  %v3180_v4 = vld [vmem:[%s4031_s1 + $0x410] sm:$0xff] }
  0x64   :  { %1951 = vmatpush.bf16.msrb.mxu3 %v3177_v61  ;;  %1875 = vmatmul.bf16.vlgmr.msra.gmra.mxu1 %v2177_v7  ;;  %v3198_v61 = vld [vmem:[%s4031_s1 + $0x4a0] sm:$0xff]  ;;  %v3204_v6 = vld [vmem:[%s4031_s1 + $0x4d0] sm:$0xff] }
  0x65   :  { %1923 = vmatpush.bf16.msrb.mxu1 %v3161_v5  ;;  %v3196_v5 = vld [vmem:[%s4031_s1 + $0x490] sm:$0xff] }
  0x66   :  { %1910 = vmatpush.bf16.msrb.mxu0 %v3152_v8  ;;  %v3188_v7 = vld [vmem:[%s4031_s1 + $0x450] sm:$0xff]  ;;  %v3179_v8 = vld [vmem:[%s4031_s1 + $0x408] sm:$0xff] }
  0x67   :  { %1938 = vmatpush.bf16.msrb.mxu2 %v3168_v9  ;;  %v3195_v9 = vld [vmem:[%s4031_s1 + $0x488] sm:$0xff] }
  0x68   :  { %1952 = vmatpush.bf16.msrb.mxu3 %v3176_v10  ;;  %v3203_v10 = vld [vmem:[%s4031_s1 + $0x4c8] sm:$0xff] }
  0x69   :  { %1924 = vmatpush.bf16.msrb.mxu1 %v3160_v11  ;;  %v3187_v11 = vld [vmem:[%s4031_s1 + $0x448] sm:$0xff] }
  0x6a   :  { %1911 = vmatpush.bf16.msrb.mxu0 %v3151_v12  ;;  %v3178_v12 = vld [vmem:[%s4031_s1 + $0x400] sm:$0xff] }
  0x6b   :  { %1939 = vmatpush.bf16.msrb.mxu2 %v3167_v13  ;;  %v3194_v13 = vld [vmem:[%s4031_s1 + $0x480] sm:$0xff] }
  0x6c   :  { %1953 = vmatpush.bf16.msrb.mxu3 %v3175_v14  ;;  %v3202_v14 = vld [vmem:[%s4031_s1 + $0x4c0] sm:$0xff] }
  0x6d   :  { %1925 = vmatpush.bf16.msrb.mxu1 %v3159_v15  ;;  %v3217_v15 = vld [vmem:[%s4031_s1 + $0x538] sm:$0xff] }
  0x6e   :  { %1912 = vmatpush.bf16.msrb.mxu0 %v3150_v16  ;;  %v3233_v16 = vld [vmem:[%s4031_s1 + $0x5b8] sm:$0xff] }
  0x6f   :  { %1940 = vmatpush.bf16.msrb.mxu2 %v3166_v17  ;;  %v2204_v17 = vld [vmem:[%s4032_s0 + $0x40] sm:$0xf] }
  0x70   :  { %1954 = vmatpush.bf16.msrb.mxu3 %v3174_v18  ;;  %v3045_v18 = vld [vmem:[%s4032_s0 + $0xa0] sm:$0xf0] }
  0x71   :  { %1926 = vmatpush.bf16.msrb.mxu1 %v3158_v19  ;;  %v2212_v19 = vld [vmem:[%s4032_s0 + $0x48] sm:$0xf] }
  0x72   :  { %1913 = vmatpush.bf16.msrb.mxu0 %v3149_v20  ;;  %v3046_v20 = vld [vmem:[%s4032_s0 + $0xa8] sm:$0xf0] }
  0x73   :  { %1941 = vmatpush.bf16.msrb.mxu2 %v3165_v21  ;;  %v3241_v21 = vld [vmem:[%s4031_s1 + $0x5f8] sm:$0xff] }
  0x74   :  { %1955 = vmatpush.bf16.msrb.mxu3 %v3173_v22  ;;  %v3034_v22 = vld [vmem:[%s4032_s0 + $0x4c] sm:$0xf] }
  0x75   :  { %1927 = vmatpush.bf16.msrb.mxu1 %v3157_v23  ;;  %v2214_v23 = vld [vmem:[%s4032_s0 + $0xac] sm:$0xf0] }
  0x76   :  { %1914 = vmatpush.bf16.msrb.mxu0 %v3148_v24  ;;  %v3186_v24 = vld [vmem:[%s4031_s1 + $0x440] sm:$0xff] }
  0x77   :  { %1942 = vmatpush.bf16.msrb.mxu2 %v3164_v25  ;;  %v3033_v25 = vld [vmem:[%s4032_s0 + $0x44] sm:$0xf] }
  0x78   :  { %1956 = vmatpush.bf16.msrb.mxu3 %v3172_v26  ;;  %v2206_v26 = vld [vmem:[%s4032_s0 + $0xa4] sm:$0xf0] }
  0x79   :  { %1928 = vmatpush.bf16.msrb.mxu1 %v3156_v27  ;;  %v2205_v27 = vor.u32 %v3045_v18, %v2204_v17 }
  0x7a   :  { %1915 = vmatpush.bf16.msrb.mxu0 %v3147_v28  ;;  %v2213_v28 = vor.u32 %v3046_v20, %v2212_v19 }
  0x7b   :  { %1943 = vmatpush.bf16.msrb.mxu2 %v3163_v29  ;;  %v3225_v29 = vld [vmem:[%s4031_s1 + $0x578] sm:$0xff] }
  0x7c   :  { %1957 = vmatpush.bf16.msrb.mxu3 %v3171_v30  ;;  %v2217_v30 = vor.u32 %v3034_v22, %v2214_v23 }
  0x7d   :  { %1929 = vmatpush.bf16.msrb.mxu1 %v3155_v31  ;;  %v2209_v31 = vor.u32 %v3033_v25, %v2206_v26 }
  0x7e   :  { %1916 = vmatpush.bf16.msrb.mxu0 %v3146_v32  ;;  %v3216_v32 = vld [vmem:[%s4031_s1 + $0x530] sm:$0xff] }
  0x7f   :  { %1944 = vmatpush.bf16.msrb.mxu2 %v3162_v33  ;;  %v3232_v33 = vld [vmem:[%s4031_s1 + $0x5b0] sm:$0xff] }
  0x80   :  { %1958 = vmatpush.bf16.msrb.mxu3 %v3170_v34  ;;  %v3240_v34 = vld [vmem:[%s4031_s1 + $0x5f0] sm:$0xff] }
  0x81   :  { %1930 = vmatpush.bf16.msrb.mxu1 %v3154_v44  ;;  %1917 = vmatmul.bf16.vlgmr.msrb.gmra.mxu0 %v2189_v47  ;;  %v3213_v44 = vld [vmem:[%s4031_s1 + $0x518] sm:$0xff] }
  0x82   :  { %1965 = vmatpush.bf16.msra.mxu0 %v3185_v35  ;;  %1945 = vmatmul.bf16.vlgmr.msrb.gmra.mxu2 %v2197_v48  ;;  %v3224_v35 = vld [vmem:[%s4031_s1 + $0x570] sm:$0xff]  ;;  %v3221_v47 = vld [vmem:[%s4031_s1 + $0x558] sm:$0xff] }
  0x83   :  { %1993 = vmatpush.bf16.msra.mxu2 %v3201_v36  ;;  %1959 = vmatmul.bf16.vlgmr.msrb.gmra.mxu3 %v2201_v50  ;;  %v3215_v36 = vld [vmem:[%s4031_s1 + $0x528] sm:$0xff]  ;;  %v3212_v48 = vld [vmem:[%s4031_s1 + $0x510] sm:$0xff] }
  0x84   :  { %2007 = vmatpush.bf16.msra.mxu3 %v3209_v41  ;;  %1931 = vmatmul.bf16.vlgmr.msrb.gmra.mxu1 %v2193_v51  ;;  %v3230_v41 = vld [vmem:[%s4031_s1 + $0x5a0] sm:$0xff]  ;;  %v3236_v50 = vld [vmem:[%s4031_s1 + $0x5d0] sm:$0xff] }
  0x85   :  { %1979 = vmatpush.bf16.msra.mxu1 %v3193_v49  ;;  %v3228_v49 = vld [vmem:[%s4031_s1 + $0x590] sm:$0xff] }
  0x86   :  { %1966 = vmatpush.bf16.msra.mxu0 %v3184_v52  ;;  %v3220_v51 = vld [vmem:[%s4031_s1 + $0x550] sm:$0xff]  ;;  %v3211_v52 = vld [vmem:[%s4031_s1 + $0x508] sm:$0xff] }
  0x87   :  { %1994 = vmatpush.bf16.msra.mxu2 %v3200_v53  ;;  %v3227_v53 = vld [vmem:[%s4031_s1 + $0x588] sm:$0xff] }
  0x88   :  { %2008 = vmatpush.bf16.msra.mxu3 %v3208_v54  ;;  %v3235_v54 = vld [vmem:[%s4031_s1 + $0x5c8] sm:$0xff] }
  0x89   :  { %1980 = vmatpush.bf16.msra.mxu1 %v3192_v55  ;;  %v3219_v55 = vld [vmem:[%s4031_s1 + $0x548] sm:$0xff] }
  0x8a   :  { %1967 = vmatpush.bf16.msra.mxu0 %v3183_v56  ;;  %v3210_v56 = vld [vmem:[%s4031_s1 + $0x500] sm:$0xff] }
  0x8b   :  { %1995 = vmatpush.bf16.msra.mxu2 %v3199_v57  ;;  %v3226_v57 = vld [vmem:[%s4031_s1 + $0x580] sm:$0xff] }
  0x8c   :  { %2009 = vmatpush.bf16.msra.mxu3 %v3207_v58  ;;  %v3234_v58 = vld [vmem:[%s4031_s1 + $0x5c0] sm:$0xff] }
  0x8d   :  { %1981 = vmatpush.bf16.msra.mxu1 %v3191_v59  ;;  %v2220_v59 = vld [vmem:[%s4032_s0 + $0x50] sm:$0xf] }
  0x8e   :  { %1968 = vmatpush.bf16.msra.mxu0 %v3182_v60  ;;  %v3047_v60 = vld [vmem:[%s4032_s0 + $0xb0] sm:$0xf0] }
  0x8f   :  { %1996 = vmatpush.bf16.msra.mxu2 %v3198_v61  ;;  %v2228_v61 = vld [vmem:[%s4032_s0 + $0x58] sm:$0xf] }
  0x90   :  { %2010 = vmatpush.bf16.msra.mxu3 %v3206_v62  ;;  %v3048_v62 = vld [vmem:[%s4032_s0 + $0xb8] sm:$0xf0] }
  0x91   :  { %1982 = vmatpush.bf16.msra.mxu1 %v3190_v63  ;;  %v3036_v63 = vld [vmem:[%s4032_s0 + $0x5c] sm:$0xf] }
  0x92   :  { %1969 = vmatpush.bf16.msra.mxu0 %v3181_v0  ;;  %v2230_v0 = vld [vmem:[%s4032_s0 + $0xbc] sm:$0xf0] }
  0x93   :  { %1997 = vmatpush.bf16.msra.mxu2 %v3197_v1  ;;  %v3245_v1 = vld [vmem:[%s4031_s1 + $0x618] sm:$0xff] }
  0x94   :  { %2011 = vmatpush.bf16.msra.mxu3 %v3205_v2  ;;  %v3218_v2 = vld [vmem:[%s4031_s1 + $0x540] sm:$0xff] }
  0x95   :  { %1983 = vmatpush.bf16.msra.mxu1 %v3189_v3  ;;  %v2221_v3 = vor.u32 %v3047_v60, %v2220_v59 }
  0x96   :  { %1970 = vmatpush.bf16.msra.mxu0 %v3180_v4  ;;  %v3035_v4 = vld [vmem:[%s4032_s0 + $0x54] sm:$0xf] }
  0x97   :  { %1998 = vmatpush.bf16.msra.mxu2 %v3196_v5  ;;  %v2222_v5 = vld [vmem:[%s4032_s0 + $0xb4] sm:$0xf0] }
  0x98   :  { %2012 = vmatpush.bf16.msra.mxu3 %v3204_v6  ;;  %v2229_v6 = vor.u32 %v3048_v62, %v2228_v61 }
  0x99   :  { %1984 = vmatpush.bf16.msra.mxu1 %v3188_v7  ;;  %v2233_v7 = vor.u32 %v3036_v63, %v2230_v0  ;;  %v2095_v0 = vld [vmem:[%s4034_s2 + $0x10] sm:$0xff] }
  0x9a   :  { %1971 = vmatpush.bf16.msra.mxu0 %v3179_v8  ;;  %v2225_v8 = vor.u32 %v3035_v4, %v2222_v5 }
  0x9b   :  { %1999 = vmatpush.bf16.msra.mxu2 %v3195_v9  ;;  %v3244_v9 = vld [vmem:[%s4031_s1 + $0x610] sm:$0xff] }
  0x9c   :  { %2013 = vmatpush.bf16.msra.mxu3 %v3203_v10  ;;  %v3243_v10 = vld [vmem:[%s4031_s1 + $0x608] sm:$0xff] }
  0x9d   :  { %1985 = vmatpush.bf16.msra.mxu1 %v3187_v11  ;;  %v3242_v11 = vld [vmem:[%s4031_s1 + $0x600] sm:$0xff] }
  0x9e   :  { %1972 = vmatpush.bf16.msra.mxu0 %v3178_v12  ;;  %v2236_v12 = vld [vmem:[%s4032_s0 + $0x60] sm:$0xf] }
  0x9f   :  { %2000 = vmatpush.bf16.msra.mxu2 %v3194_v13  ;;  %v3049_v13 = vld [vmem:[%s4032_s0 + $0xc0] sm:$0xf0] }
  0xa0   :  { %2014 = vmatpush.bf16.msra.mxu3 %v3202_v14  ;;  %v2237_v14 = vor.u32 %v3049_v13, %v2236_v12  ;;  %v2093_v13 = vld [vmem:[%s4034_s2] sm:$0xff] }
  0xa1   :  { %1986 = vmatpush.bf16.msra.mxu1 %v3186_v24  ;;  %1973 = vmatmul.bf16.vlgmr.msra.gmra.mxu0 %v2205_v27 }
  0xa2   :  { %2021 = vmatpush.bf16.msrb.mxu0 %v3217_v15  ;;  %2001 = vmatmul.bf16.vlgmr.msra.gmra.mxu2 %v2213_v28  ;;  %v1750_v15 = vpop.f32.mrf.mxu0 }
  0xa3   :  { %2049 = vmatpush.bf16.msrb.mxu2 %v3233_v16  ;;  %2015 = vmatmul.bf16.vlgmr.msra.gmra.mxu3 %v2217_v30  ;;  %v1764_v16 = vpop.f32.mrf.mxu1 }
  0xa4   :  { %2063 = vmatpush.bf16.msrb.mxu3 %v3241_v21  ;;  %1987 = vmatmul.bf16.vlgmr.msra.gmra.mxu1 %v2209_v31 }
  0xa5   :  { %2035 = vmatpush.bf16.msrb.mxu1 %v3225_v29  ;;  %v1778_v17 = vpop.f32.mrf.mxu2  ;;  %v1765_v29 = vadd.f32 %v1764_v16, %v1750_v15 }
  0xa6   :  { %2022 = vmatpush.bf16.msrb.mxu0 %v3216_v32  ;;  %v1792_v19 = vpop.f32.mrf.mxu3 }
  0xa7   :  { %2050 = vmatpush.bf16.msrb.mxu2 %v3232_v33  ;;  %v1779_v32 = vadd.f32 %v1778_v17, %v1765_v29 }
  0xa8   :  { %2064 = vmatpush.bf16.msrb.mxu3 %v3240_v34 }
  0xa9   :  { %2036 = vmatpush.bf16.msrb.mxu1 %v3224_v35  ;;  %v1793_v35 = vadd.f32 %v1792_v19, %v1779_v32 }
  0xaa   :  { %2023 = vmatpush.bf16.msrb.mxu0 %v3215_v36  ;;  %v1752_v18 = vpop.f32.mrf.mxu0 }
  0xab   :  { %2051 = vmatpush.bf16.msrb.mxu2 %v3231_v37  ;;  %v1766_v20 = vpop.f32.mrf.mxu1 }
  0xac   :  { %2065 = vmatpush.bf16.msrb.mxu3 %v3239_v38  ;;  %v1767_v37 = vadd.f32 %v1766_v20, %v1752_v18 }
  0xad   :  { %2037 = vmatpush.bf16.msrb.mxu1 %v3223_v39  ;;  %v1780_v21 = vpop.f32.mrf.mxu2 }
  0xae   :  { %2024 = vmatpush.bf16.msrb.mxu0 %v3214_v40  ;;  %v1794_v23 = vpop.f32.mrf.mxu3 }
  0xaf   :  { %2052 = vmatpush.bf16.msrb.mxu2 %v3230_v41  ;;  %v1781_v41 = vadd.f32 %v1780_v21, %v1767_v37 }
  0xb0   :  { %2066 = vmatpush.bf16.msrb.mxu3 %v3238_v42 }
  0xb1   :  { %2038 = vmatpush.bf16.msrb.mxu1 %v3222_v43 }
  0xb2   :  { %2025 = vmatpush.bf16.msrb.mxu0 %v3213_v44  ;;  %v1795_v44 = vadd.f32 %v1794_v23, %v1781_v41 }
  0xb3   :  { %2053 = vmatpush.bf16.msrb.mxu2 %v3229_v45 }
  0xb4   :  { %2067 = vmatpush.bf16.msrb.mxu3 %v3237_v46 }
  0xb5   :  { %2039 = vmatpush.bf16.msrb.mxu1 %v3221_v47 }
  0xb6   :  { %2026 = vmatpush.bf16.msrb.mxu0 %v3212_v48 }
  0xb7   :  { %2054 = vmatpush.bf16.msrb.mxu2 %v3228_v49 }
  0xb8   :  { %2068 = vmatpush.bf16.msrb.mxu3 %v3236_v50 }
  0xb9   :  { %2040 = vmatpush.bf16.msrb.mxu1 %v3220_v51 }
  0xba   :  { %2027 = vmatpush.bf16.msrb.mxu0 %v3211_v52 }
  0xbb   :  { %2055 = vmatpush.bf16.msrb.mxu2 %v3227_v53 }
  0xbc   :  { %2069 = vmatpush.bf16.msrb.mxu3 %v3235_v54 }
  0xbd   :  { %2041 = vmatpush.bf16.msrb.mxu1 %v3219_v55 }
  0xbe   :  { %2028 = vmatpush.bf16.msrb.mxu0 %v3210_v56  ;;  %v1806_v22 = vpop.f32.mrf.mxu0  ;;  %v2096_v56 = vld [vmem:[%s4034_s2 + $0x18] sm:$0xff] }
  0xbf   :  { %2056 = vmatpush.bf16.msrb.mxu2 %v3226_v57  ;;  %v1807_v38 = vadd.f32 %v1806_v22, %v1793_v35 }
  0xc0   :  { %2070 = vmatpush.bf16.msrb.mxu3 %v3234_v58 }
  0xc1   :  { %2042 = vmatpush.bf16.msrb.mxu1 %v3218_v2  ;;  %2029 = vmatmul.bf16.vlgmr.msrb.gmra.mxu0 %v2221_v3  ;;  %v1820_v24 = vpop.f32.mrf.mxu1  ;;  %v2094_v2 = vld [vmem:[%s4034_s2 + $0x8] sm:$0xff] }
  0xc2   :  { %2081 = vmatpush.bf16.msra.mxu0 %v3245_v1  ;;  %2057 = vmatmul.bf16.vlgmr.msrb.gmra.mxu2 %v2229_v6  ;;  %v1821_v42 = vadd.f32 %v1820_v24, %v1807_v38 }
  0xc3   :  { %2071 = vmatmul.bf16.vlgmr.msrb.gmra.mxu3 %v2233_v7 }
  0xc4   :  { %2043 = vmatmul.bf16.vlgmr.msrb.gmra.mxu1 %v2225_v8 }
  0xc5   :  { %v1834_v25 = vpop.f32.mrf.mxu2  ;;  %2120 = vmatpush.msra.mxu1 %v2096_v56 }
  0xc6   :  { %2082 = vmatpush.bf16.msra.mxu0 %v3244_v9  ;;  %v1808_v26 = vpop.f32.mrf.mxu0  ;;  %v1848_v27 = vpop.f32.mrf.mxu3  ;;  %v1835_v45 = vadd.f32 %v1834_v25, %v1821_v42 }
  0xc7   :  { %v1809_v48 = vadd.f32 %v1808_v26, %v1795_v44  ;;  %2121 = vmatpush.msra.mxu1 %v2095_v0 }
  0xc8   :  { %v1849_v49 = vadd.f32 %v1848_v27, %v1835_v45 }
  0xc9   :  { %v1822_v28 = vpop.f32.mrf.mxu1  ;;  %2122 = vmatpush.msra.mxu1 %v2094_v2 }
  0xca   :  { %2083 = vmatpush.bf16.msra.mxu0 %v3243_v10  ;;  %v1823_v52 = vadd.f32 %v1822_v28, %v1809_v48 }
  0xcb   :  { %2123 = vmatpush.msra.mxu1 %v2093_v13 }
  0xcd   :  { %v1836_v30 = vpop.f32.mrf.mxu2 }
  0xce   :  { %2084 = vmatpush.bf16.msra.mxu0 %v3242_v11  ;;  %v1850_v33 = vpop.f32.mrf.mxu3  ;;  %v1837_v54 = vadd.f32 %v1836_v30, %v1823_v52 }
  0xd0   :  { %v1851_v59 = vadd.f32 %v1850_v33, %v1837_v54 }
  0xd1   :  { %3022 = vmatmul.msk.bf16.vlgmr.msra.gmra.mxu0 %vm1737_vm0, %v2237_v14 }
  0xde   :  { %v1862_v31 = vpop.f32.mrf.mxu0 }
  0xdf   :  { %v1863_v53 = vadd.f32 %v1862_v31, %v1849_v49 }
  0xe1   :  { %v1876_v34 = vpop.f32.mrf.mxu1 }
  0xe2   :  { %v1877_v57 = vadd.f32 %v1876_v34, %v1863_v53 }
  0xe5   :  { %v1890_v36 = vpop.f32.mrf.mxu2 }
  0xe6   :  { %v1864_v39 = vpop.f32.mrf.mxu0  ;;  %v1904_v40 = vpop.f32.mrf.mxu3  ;;  %v1891_v60 = vadd.f32 %v1890_v36, %v1877_v57 }
  0xe7   :  { %v1865_v62 = vadd.f32 %v1864_v39, %v1851_v59 }
  0xe8   :  { %v1905_v1 = vadd.f32 %v1904_v40, %v1891_v60 }
  0xe9   :  { %v1878_v43 = vpop.f32.mrf.mxu1 }
  0xea   :  { %v1879_v3 = vadd.f32 %v1878_v43, %v1865_v62 }
  0xed   :  { %v1892_v46 = vpop.f32.mrf.mxu2 }
  0xee   :  { %v1906_v50 = vpop.f32.mrf.mxu3  ;;  %v1893_v7 = vadd.f32 %v1892_v46, %v1879_v3 }
  0xf0   :  { %v1907_v11 = vadd.f32 %v1906_v50, %v1893_v7 }
  0xfe   :  { %v1918_v47 = vpop.f32.mrf.mxu0 }
  0xff   :  { %v1919_v4 = vadd.f32 %v1918_v47, %v1905_v1 }
 0x101   :  { %v1932_v51 = vpop.f32.mrf.mxu1 }
 0x102   :  { %v1933_v8 = vadd.f32 %v1932_v51, %v1919_v4 }
 0x105   :  { %v1946_v55 = vpop.f32.mrf.mxu2 }
 0x106   :  { %v1920_v58 = vpop.f32.mrf.mxu0  ;;  %v1960_v61 = vpop.f32.mrf.mxu3  ;;  %v1947_v12 = vadd.f32 %v1946_v55, %v1933_v8  ;;  %v3246_v55 = vld [vmem:[%s4033_s3] ss:$0 sm:$0xff] }
 0x107   :  { %v1921_v14 = vadd.f32 %v1920_v58, %v1907_v11 }
 0x108   :  { %v1961_v16 = vadd.f32 %v1960_v61, %v1947_v12 }
 0x109   :  { %v1934_v63 = vpop.f32.mrf.mxu1 }
 0x10a   :  { %v1935_v18 = vadd.f32 %v1934_v63, %v1921_v14 }
 0x10d   :  { %v1948_v5 = vpop.f32.mrf.mxu2 }
 0x10e   :  { %v1962_v9 = vpop.f32.mrf.mxu3  ;;  %v1949_v21 = vadd.f32 %v1948_v5, %v1935_v18 }
 0x110   :  { %v1963_v24 = vadd.f32 %v1962_v9, %v1949_v21 }
 0x11e   :  { %v1974_v6 = vpop.f32.mrf.mxu0 }
 0x11f   :  { %v1975_v19 = vadd.f32 %v1974_v6, %v1961_v16 }
 0x121   :  { %v1988_v10 = vpop.f32.mrf.mxu1 }
 0x122   :  { %v1989_v23 = vadd.f32 %v1988_v10, %v1975_v19 }
 0x125   :  { %v2002_v15 = vpop.f32.mrf.mxu2 }
 0x126   :  { %v1976_v17 = vpop.f32.mrf.mxu0  ;;  %v2016_v20 = vpop.f32.mrf.mxu3  ;;  %v2003_v25 = vadd.f32 %v2002_v15, %v1989_v23 }
 0x127   :  { %v1977_v28 = vadd.f32 %v1976_v17, %v1963_v24 }
 0x128   :  { %v2017_v29 = vadd.f32 %v2016_v20, %v2003_v25 }
 0x129   :  { %v1990_v22 = vpop.f32.mrf.mxu1 }
 0x12a   :  { %v1991_v32 = vadd.f32 %v1990_v22, %v1977_v28 }
 0x12d   :  { %v2004_v26 = vpop.f32.mrf.mxu2 }
 0x12e   :  { %v2018_v30 = vpop.f32.mrf.mxu3  ;;  %v2005_v34 = vadd.f32 %v2004_v26, %v1991_v32 }
 0x130   :  { %v2019_v38 = vadd.f32 %v2018_v30, %v2005_v34 }
 0x13e   :  { %v2030_v27 = vpop.f32.mrf.mxu0 }
 0x13f   :  { %v2031_v33 = vadd.f32 %v2030_v27, %v2017_v29 }
 0x141   :  { %v2044_v31 = vpop.f32.mrf.mxu1 }
 0x142   :  { %v2045_v37 = vadd.f32 %v2044_v31, %v2031_v33 }
 0x145   :  { %v2058_v35 = vpop.f32.mrf.mxu2 }
 0x146   :  { %v2032_v36 = vpop.f32.mrf.mxu0  ;;  %v2059_v39 = vadd.f32 %v2058_v35, %v2045_v37  ;;  %v2072_v40 = vpop.f32.mrf.mxu3 }
 0x147   :  { %v2033_v41 = vadd.f32 %v2032_v36, %v2019_v38 }
 0x148   :  { %v2073_v43 = vadd.f32 %v2072_v40, %v2059_v39 }
 0x149   :  { %v2046_v42 = vpop.f32.mrf.mxu1 }
 0x14a   :  { %v2047_v46 = vadd.f32 %v2046_v42, %v2033_v41 }
 0x14d   :  { %v2060_v44 = vpop.f32.mrf.mxu2 }
 0x14e   :  { %v2086_v45 = vpop.f32.mrf.mxu0  ;;  %v2061_v48 = vadd.f32 %v2060_v44, %v2047_v46  ;;  %v2074_v50 = vpop.f32.mrf.mxu3 }
 0x14f   :  { %v2087_v47 = vadd.f32 %v2086_v45, %v2073_v43 }
 0x150   :  { %v2075_v51 = vadd.f32 %v2074_v50, %v2061_v48 }
 0x151   :  { %v2091_v49 = vmax.f32 %v2087_v47, 0.0 }
 0x153   :  { %3023 = vmatmul.msk.f32.vlgmr.msra.gmra.mxu1 %vm2101_vm1, %v2091_v49 }
 0x156   :  { %v2088_v52 = vpop.f32.mrf.mxu0 }
 0x157   :  { %v2089_v53 = vadd.f32 %v2088_v52, %v2075_v51 }
 0x159   :  { %v2092_v54 = vmax.f32 %v2089_v53, 0.0 }
 0x15b   :  { %3024 = vmatmul.msk.f32.gmra.mxu1 %vm2101_vm1, %v2092_v54 }
 0x1d0   :  { %v2125_v56 = vpop.f32.mrf.mxu1 }
 0x1d1   :  { %v2126_v57 = vadd.f32 %v3246_v55, %v2125_v56 }
 0x1d3   :  { %2132 = vst.msk [vmem:[%s4035_s4] sm:$0xff] %vm2131_vm2, %v2126_v57 }
 0x1d8   :  { %v2128_v58 = vpop.f32.mrf.mxu1 }
 0x1d9   :  { %v2129_v59 = vadd.f32 %v3246_v55, %v2128_v58 }
 0x1db   :  { %2133 = vst.msk [vmem:[%s4035_s4 + $0x8] sm:$0xff] %vm2131_vm2, %v2129_v59 }

</bundles_post_ra>
